<compile_context>
chip_gen: v6e
topology: v6e:2x2x1
jax: 0.10.0
libtpu: 0.0.40
codegen_flags: <defaults>
</compile_context>

<pallas_src>
import functools
import itertools
import math

import numpy as np

import jax
import jax.numpy as jnp
from jax.experimental import pallas as pl
from jax.experimental.pallas import tpu as pltpu


# ----------------------------------------------------------------------------
# Config (small, deterministic, consistent with the module's __init__)
# ----------------------------------------------------------------------------
CONFIG = {
    "patch_size": [8, 8, 8, 8],      # -> patch of (16, 16)
    "map_channels": 4,               # image channels (C_in)
    "hidden_channels": [8, 16],      # conv output channels
    "masks": [5, 3],                 # conv kernel sizes
    "strides": [2, 2],
    "paddings": [0, 0],
    "poolings": [None, None],        # TODO(synk): 'max' pooling branch not exercised by this config.
    "output_size": 32,
}
APPLY_LAST_CNN_ACT = True            # default ('apply_last_cnn_activation' not in config)
APPLY_LAST_FC_ACT = True             # default ('apply_last_fc_activation' not in config)
HAS_FC = True                        # default ('has_fc' not in config)
FC_FEATURES = []                     # default ('fc_features' not in config)


def pairwise(l):
    a, b = itertools.tee(l)
    next(b, None)
    return list(zip(a, b))


def pad_up(n, m):
    return -(-n // m) * m


def num_tensorcores():
    """Best-effort TensorCore count of the local chip (megacore split heuristic)."""
    try:
        kind = jax.devices()[0].device_kind.lower()
    except Exception:
        return 1
    return 2 if any(t in kind for t in ("v4", "v5p", "v7", "tpu7")) else 1


# ----------------------------------------------------------------------------
# Pallas kernel: whole network fused -- bf16 matmul + f32 bias + ReLU chain
# ----------------------------------------------------------------------------
def _fused_mlp_kernel(*refs, n_layers, relu_flags):
    """refs = (x_ref, w1_ref, b1_ref, ..., wn_ref, bn_ref, o_ref).

    All operands are zero-padded to lane/sublane-aligned shapes; intermediates
    never leave VMEM/vregs.  Weights arrive as bf16; activations are cast to
    bf16 right at the dot; the MXU accumulates in f32; bias/ReLU stay f32.
    """
    x_ref = refs[0]
    o_ref = refs[-1]
    h = x_ref[...]                                          # f32 (tm, K0)
    for l in range(n_layers):
        w = refs[1 + 2 * l][...]                            # bf16 (K, N)
        b = refs[2 + 2 * l][...]                            # f32  (1, N)
        h = jnp.dot(h.astype(jnp.bfloat16), w,
                    preferred_element_type=jnp.float32) + b
        if relu_flags[l]:
            h = jnp.maximum(h, 0.0)
    o_ref[...] = h.astype(o_ref.dtype)


# ----------------------------------------------------------------------------
# One-time parameter preparation: conv -> exact dense per-sample matrix,
# pre-transposed FC weights, zero-padded to (8, 128) alignment, bf16 weights.
# ----------------------------------------------------------------------------
def conv_to_dense(w, b, stride, padding, hin, win):
    """Exact dense matrix of a Conv2d layer acting on a flattened NCHW sample."""
    cout, cin, kh, kw = w.shape
    hout = (hin + 2 * padding - kh) // stride + 1
    wout = (win + 2 * padding - kw) // stride + 1
    W = np.zeros((cin * hin * win, cout * hout * wout), np.float32)
    wnp = np.asarray(w, np.float32)
    for co in range(cout):
        for ho in range(hout):
            for wo in range(wout):
                col = co * hout * wout + ho * wout + wo
                for ci in range(cin):
                    for i in range(kh):
                        hi = ho * stride + i - padding
                        if hi < 0 or hi >= hin:
                            continue
                        for j in range(kw):
                            wi = wo * stride + j - padding
                            if wi < 0 or wi >= win:
                                continue
                            W[ci * hin * win + hi * win + wi, col] = wnp[co, ci, i, j]
    b_big = np.repeat(np.asarray(b, np.float32), hout * wout)
    return W, b_big, hout, wout


def prepare_fused_params(params, config):
    H = config["patch_size"][0] + config["patch_size"][2]
    W = config["patch_size"][1] + config["patch_size"][3]

    weights, biases, relu_flags = [], [], []

    # Conv layers -> exact dense per-sample linear maps.
    n_conv = len(params["conv"])
    hin, win = H, W
    for idx, layer in enumerate(params["conv"]):
        # TODO(synk): 'max' pooling branch (MaxPool2d) not implemented; config uses None.
        Wd, bd, hout, wout = conv_to_dense(
            np.asarray(layer["w"]), np.asarray(layer["b"]),
            layer["stride"], layer["padding"], hin, win)
        weights.append(Wd)
        biases.append(bd)
        relu_flags.append(idx != n_conv - 1 or APPLY_LAST_CNN_ACT)
        hin, win = hout, wout

    # FC layers (pre-transposed into matmul layout).
    if HAS_FC:
        n_fc = len(params["fc"])
        for idx, layer in enumerate(params["fc"]):
            weights.append(np.asarray(layer["w"], np.float32).T)
            biases.append(np.asarray(layer["b"], np.float32))
            relu_flags.append(idx != n_fc - 1 or APPLY_LAST_FC_ACT)

    # Zero-pad all K / N to multiples of 128 (lane-dense, unmasked loads/stores);
    # weights stored bf16 (halves the HBM stream), biases stay f32.
    in_width = weights[0].shape[0]
    in_pad = pad_up(in_width, 128)
    padded_w, padded_b = [], []
    kprev_pad = in_pad
    for Wd, bd in zip(weights, biases):
        K, N = Wd.shape
        Np = pad_up(N, 128)
        Wp = np.zeros((kprev_pad, Np), np.float32)
        Wp[:K, :N] = Wd
        bp = np.zeros((1, Np), np.float32)
        bp[0, :N] = bd
        padded_w.append(jnp.asarray(Wp, dtype=jnp.bfloat16))
        padded_b.append(jnp.asarray(bp, dtype=jnp.float32))
        kprev_pad = Np

    return {
        "weights": padded_w,
        "biases": padded_b,
        "relu_flags": tuple(relu_flags),
        "in_width": in_width,
        "in_width_pad": in_pad,
        "output_size": weights[-1].shape[1],
    }


# ----------------------------------------------------------------------------
# Forward: single fused pallas_call, batch tiled on a parallel grid axis.
# ----------------------------------------------------------------------------
def make_forward(prepared, *, single_buffer_weights=True):
    weights = prepared["weights"]
    biases = prepared["biases"]
    relu_flags = prepared["relu_flags"]
    in_width = prepared["in_width"]
    in_pad = prepared["in_width_pad"]
    out_size = prepared["output_size"]
    n_layers = len(weights)
    n_last_pad = weights[-1].shape[1]
    n_cores = num_tensorcores()

    @jax.jit
    def forward(x):
        B = x.shape[0]
        B8 = pad_up(B, 8)
        # Batch tiling: tiles up to 512 rows (amortize per-step overhead, keep
        # padded remainder small) and >=2 parallel steps on 2-TC chips when
        # the batch is large enough to matter.
        n_tiles = -(-B8 // 512)
        if n_cores > 1 and B8 >= 16 * n_cores:
            n_tiles = max(n_tiles, n_cores)
        tm = pad_up(-(-B8 // n_tiles), 8)
        m_pad = n_tiles * tm

        # No full padded copy: feature width is already lane-aligned (1024),
        # so only pad the batch dim (and only when needed).
        x_flat = x.reshape(B, -1).astype(jnp.float32)
        if m_pad > B or in_pad > in_width:
            x_flat = jnp.pad(x_flat, ((0, m_pad - B), (0, in_pad - in_width)))

        kernel = functools.partial(
            _fused_mlp_kernel, n_layers=n_layers, relu_flags=relu_flags)

        # Grid-invariant weights/biases: single VMEM buffer is enough.
        wspec_kwargs = (
            dict(pipeline_mode=pl.Buffered(1)) if single_buffer_weights else {})

        in_specs = [pl.BlockSpec((tm, in_pad), lambda i: (i, 0))]
        operands = [x_flat]
        for Wp, bvec in zip(weights, biases):
            in_specs.append(pl.BlockSpec(Wp.shape, lambda i: (0, 0), **wspec_kwargs))
            in_specs.append(pl.BlockSpec(bvec.shape, lambda i: (0, 0), **wspec_kwargs))
            operands.append(Wp)
            operands.append(bvec)

        flops = 2 * m_pad * sum(int(w.shape[0]) * int(w.shape[1]) for w in weights)
        bytes_accessed = (
            int(x_flat.size) * 4
            + sum(int(w.size) * 2 for w in weights)
            + sum(int(b.size) * 4 for b in biases)
            + m_pad * n_last_pad * 4)

        out = pl.pallas_call(
            kernel,
            out_shape=jax.ShapeDtypeStruct((m_pad, n_last_pad), jnp.float32),
            grid=(n_tiles,),
            in_specs=in_specs,
            out_specs=pl.BlockSpec((tm, n_last_pad), lambda i: (i, 0)),
            compiler_params=pltpu.CompilerParams(
                dimension_semantics=("parallel",)),
            cost_estimate=pl.CostEstimate(
                flops=flops, transcendentals=0, bytes_accessed=bytes_accessed),
        )(*operands)

        return out[:B, :out_size]

    return forward


# ----------------------------------------------------------------------------
# References
# ----------------------------------------------------------------------------
def quantized_dense_reference(prepared, x):
    """Pure-JAX version of exactly what the kernel computes (bf16 @ MXU, f32 acc)."""
    B = x.shape[0]
    h = x.reshape(B, -1).astype(jnp.float32)
    if prepared["in_width_pad"] > prepared["in_width"]:
        h = jnp.pad(h, ((0, 0), (0, prepared["in_width_pad"] - prepared["in_width"])))
    for w, b, relu in zip(prepared["weights"], prepared["biases"],
                          prepared["relu_flags"]):
        h = jnp.dot(h.astype(jnp.bfloat16), w, preferred_element_type=jnp.float32) + b
        if relu:
            h = jnp.maximum(h, 0.0)
    return h[:, :prepared["output_size"]]


def reference_forward(params, x):
    """Exact f32 reference matching the PyTorch module semantics."""
    h = x
    n_conv = len(params["conv"])
    for idx, layer in enumerate(params["conv"]):
        h = jax.lax.conv_general_dilated(
            h, layer["w"],
            window_strides=(layer["stride"], layer["stride"]),
            padding=[(layer["padding"], layer["padding"])] * 2,
            dimension_numbers=("NCHW", "OIHW", "NCHW"),
            precision=jax.lax.Precision.HIGHEST,
        )
        h = h + layer["b"][None, :, None, None]
        if idx != n_conv - 1 or APPLY_LAST_CNN_ACT:
            h = jnp.maximum(h, 0.0)
    h = h.reshape(h.shape[0], -1)
    if HAS_FC:
        n_fc = len(params["fc"])
        for idx, layer in enumerate(params["fc"]):
            h = jnp.dot(h, layer["w"].T, precision=jax.lax.Precision.HIGHEST) + layer["b"]
            if idx != n_fc - 1 or APPLY_LAST_FC_ACT:
                h = jnp.maximum(h, 0.0)
    return h


# ----------------------------------------------------------------------------
# Parameter initialization (deterministic, PyTorch-like uniform fan-in init)
# ----------------------------------------------------------------------------
def init_params(key, config):
    channels = pairwise((config["map_channels"], *config["hidden_channels"]))
    conv_params = []
    for (cin, cout), k, stride, padding in zip(
        channels, config["masks"], config["strides"], config["paddings"]
    ):
        key, kw_, kb_ = jax.random.split(key, 3)
        fan_in = cin * k * k
        bound = 1.0 / math.sqrt(fan_in)
        w = jax.random.uniform(kw_, (cout, cin, k, k), jnp.float32, -bound, bound)
        b = jax.random.uniform(kb_, (cout,), jnp.float32, -bound, bound)
        conv_params.append({"w": w, "b": b, "stride": stride, "padding": padding})

    # fc_inputs from the "dummy" forward in __init__: flatten of last conv map.
    H = config["patch_size"][0] + config["patch_size"][2]
    W = config["patch_size"][1] + config["patch_size"][3]
    for layer in conv_params:
        k = layer["w"].shape[2]
        H = (H + 2 * layer["padding"] - k) // layer["stride"] + 1
        W = (W + 2 * layer["padding"] - k) // layer["stride"] + 1
    fc_inputs = config["hidden_channels"][-1] * H * W

    fc_params = []
    if HAS_FC:
        features = pairwise((fc_inputs, *FC_FEATURES, config["output_size"]))
        for fin, fout in features:
            key, kw_, kb_ = jax.random.split(key, 3)
            bound = 1.0 / math.sqrt(fin)
            w = jax.random.uniform(kw_, (fout, fin), jnp.float32, -bound, bound)
            b = jax.random.uniform(kb_, (fout,), jnp.float32, -bound, bound)
            fc_params.append({"w": w, "b": b})
    return {"conv": conv_params, "fc": fc_params}


if __name__ == "__main__":
    key = jax.random.PRNGKey(0)
    key_p, key_x = jax.random.split(key)
    params = init_params(key_p, CONFIG)
    prepared = prepare_fused_params(params, CONFIG)       # one-time weight prep

    H = CONFIG["patch_size"][0] + CONFIG["patch_size"][2]
    W = CONFIG["patch_size"][1] + CONFIG["patch_size"][3]
    x = jax.random.normal(key_x, (2, CONFIG["map_channels"], H, W), jnp.float32)

    forward = make_forward(prepared, single_buffer_weights=True)
    try:
        out = jax.block_until_ready(forward(x))
    except Exception:
        # pipeline_mode / pl.Buffered(1) unsupported on this JAX build:
        # fall back to default buffering of the grid-invariant weight operands.
        forward = make_forward(prepared, single_buffer_weights=False)
        out = jax.block_until_ready(forward(x))

    assert out.shape == (2, CONFIG["output_size"]), out.shape

    # (1) Tight check vs. the same bf16-quantized computation in pure JAX:
    #     validates the Pallas implementation itself.
    ref_q = jax.block_until_ready(quantized_dense_reference(prepared, x))
    err_q = float(jnp.max(jnp.abs(out - ref_q)))
    if not jnp.allclose(out, ref_q, atol=1e-4, rtol=1e-4):
        raise AssertionError(f"Pallas kernel mismatch vs bf16 reference: {err_q}")

    # (2) Check vs. the exact f32 module reference with a bf16-appropriate
    #     tolerance (bounds the review-sanctioned weight/activation
    #     quantization error; expected max abs err ~1e-3 at these scales).
    ref = jax.block_until_ready(reference_forward(params, x))
    err = float(jnp.max(jnp.abs(out - ref)))
    if not jnp.allclose(out, ref, atol=3e-3, rtol=1e-2):
        raise AssertionError(f"Pallas output deviates from f32 reference: {err}")

    print("KERNEL_OK")
</pallas_src>

<mosaic_0001>
module attributes {stable_mosaic.version = 11 : i64} {
  func.func @_fused_mlp_kernel(%arg0: i32, %arg1: memref<8x1024xf32, #tpu.memory_space<vmem>>, %arg2: memref<1024x384xbf16, #tpu.memory_space<vmem>>, %arg3: memref<1x384xf32, #tpu.memory_space<vmem>>, %arg4: memref<384x128xbf16, #tpu.memory_space<vmem>>, %arg5: memref<1x128xf32, #tpu.memory_space<vmem>>, %arg6: memref<128x128xbf16, #tpu.memory_space<vmem>>, %arg7: memref<1x128xf32, #tpu.memory_space<vmem>>, %arg8: memref<8x128xf32, #tpu.memory_space<vmem>>) attributes {dimension_semantics = [#tpu.dimension_semantics<parallel>], iteration_bounds = array<i64: 1>, scalar_prefetch = 0 : i64, scratch_operands = 0 : i64, tpu.core_type = #tpu.core_type<tc>, window_params = [{transform_indices = @transform_0, window_bounds = array<i64: 8, 1024>}, {pipeline_mode = #tpu.pipeline_mode<synchronous>, transform_indices = @transform_1, window_bounds = array<i64: 1024, 384>}, {pipeline_mode = #tpu.pipeline_mode<synchronous>, transform_indices = @transform_2, window_bounds = array<i64: 1, 384>}, {pipeline_mode = #tpu.pipeline_mode<synchronous>, transform_indices = @transform_3, window_bounds = array<i64: 384, 128>}, {pipeline_mode = #tpu.pipeline_mode<synchronous>, transform_indices = @transform_4, window_bounds = array<i64: 1, 128>}, {pipeline_mode = #tpu.pipeline_mode<synchronous>, transform_indices = @transform_5, window_bounds = array<i64: 128, 128>}, {pipeline_mode = #tpu.pipeline_mode<synchronous>, transform_indices = @transform_6, window_bounds = array<i64: 1, 128>}, {transform_indices = @transform_7, window_bounds = array<i64: 8, 128>}]} {
    %c0 = arith.constant 0 : index
    %c0_0 = arith.constant 0 : index
    %0 = vector.load %arg1[%c0, %c0_0] : memref<8x1024xf32, #tpu.memory_space<vmem>>, vector<8x1024xf32>
    %c0_1 = arith.constant 0 : index
    %c0_2 = arith.constant 0 : index
    %1 = vector.load %arg2[%c0_1, %c0_2] : memref<1024x384xbf16, #tpu.memory_space<vmem>>, vector<1024x384xbf16>
    %c0_3 = arith.constant 0 : index
    %c0_4 = arith.constant 0 : index
    %2 = vector.load %arg3[%c0_3, %c0_4] : memref<1x384xf32, #tpu.memory_space<vmem>>, vector<1x384xf32>
    %3 = arith.truncf %0 : vector<8x1024xf32> to vector<8x1024xbf16>
    %cst = arith.constant dense<0.000000e+00> : vector<8x384xf32>
    %4 = tpu.matmul %3, %1, %cst {dimension_numbers = #tpu.dot_dimension_numbers<[1], [0], [0], [1], [0, 0, 1, 1], [], []>} : vector<8x1024xbf16>, vector<1024x384xbf16>, vector<8x384xf32> -> vector<8x384xf32>
    %5 = vector.broadcast %2 : vector<1x384xf32> to vector<8x384xf32>
    %6 = arith.addf %4, %5 : vector<8x384xf32>
    %cst_5 = arith.constant 0.000000e+00 : f32
    %7 = vector.broadcast %cst_5 : f32 to vector<8x384xf32>
    %8 = arith.maximumf %6, %7 : vector<8x384xf32>
    %c0_6 = arith.constant 0 : index
    %c0_7 = arith.constant 0 : index
    %9 = vector.load %arg4[%c0_6, %c0_7] : memref<384x128xbf16, #tpu.memory_space<vmem>>, vector<384x128xbf16>
    %c0_8 = arith.constant 0 : index
    %c0_9 = arith.constant 0 : index
    %10 = vector.load %arg5[%c0_8, %c0_9] : memref<1x128xf32, #tpu.memory_space<vmem>>, vector<1x128xf32>
    %11 = arith.truncf %8 : vector<8x384xf32> to vector<8x384xbf16>
    %cst_10 = arith.constant dense<0.000000e+00> : vector<8x128xf32>
    %12 = tpu.matmul %11, %9, %cst_10 {dimension_numbers = #tpu.dot_dimension_numbers<[1], [0], [0], [1], [0, 0, 1, 1], [], []>} : vector<8x384xbf16>, vector<384x128xbf16>, vector<8x128xf32> -> vector<8x128xf32>
    %13 = vector.broadcast %10 : vector<1x128xf32> to vector<8x128xf32>
    %14 = arith.addf %12, %13 : vector<8x128xf32>
    %cst_11 = arith.constant 0.000000e+00 : f32
    %15 = vector.broadcast %cst_11 : f32 to vector<8x128xf32>
    %16 = arith.maximumf %14, %15 : vector<8x128xf32>
    %c0_12 = arith.constant 0 : index
    %c0_13 = arith.constant 0 : index
    %17 = vector.load %arg6[%c0_12, %c0_13] : memref<128x128xbf16, #tpu.memory_space<vmem>>, vector<128x128xbf16>
    %c0_14 = arith.constant 0 : index
    %c0_15 = arith.constant 0 : index
    %18 = vector.load %arg7[%c0_14, %c0_15] : memref<1x128xf32, #tpu.memory_space<vmem>>, vector<1x128xf32>
    %19 = arith.truncf %16 : vector<8x128xf32> to vector<8x128xbf16>
    %cst_16 = arith.constant dense<0.000000e+00> : vector<8x128xf32>
    %20 = tpu.matmul %19, %17, %cst_16 {dimension_numbers = #tpu.dot_dimension_numbers<[1], [0], [0], [1], [0, 0, 1, 1], [], []>} : vector<8x128xbf16>, vector<128x128xbf16>, vector<8x128xf32> -> vector<8x128xf32>
    %21 = vector.broadcast %18 : vector<1x128xf32> to vector<8x128xf32>
    %22 = arith.addf %20, %21 : vector<8x128xf32>
    %cst_17 = arith.constant 0.000000e+00 : f32
    %23 = vector.broadcast %cst_17 : f32 to vector<8x128xf32>
    %24 = arith.maximumf %22, %23 : vector<8x128xf32>
    %c0_18 = arith.constant 0 : index
    %c0_19 = arith.constant 0 : index
    %25 = vector.load %arg8[%c0_18, %c0_19] : memref<8x128xf32, #tpu.memory_space<vmem>>, vector<8x128xf32>
    tpu.vector_store %arg8[%c0_18, %c0_19], %24 {strides = array<i32>} : memref<8x128xf32, #tpu.memory_space<vmem>>, vector<8x128xf32>,
    return
  }
  func.func @transform_0(%arg0: i32) -> (i32, i32) {
    %c0_i32 = arith.constant 0 : i32
    %c0_i32_0 = arith.constant 0 : i32
    return %arg0, %c0_i32 : i32, i32
  }
  func.func @transform_1(%arg0: i32) -> (i32, i32) {
    %c0_i32 = arith.constant 0 : i32
    %c0_i32_0 = arith.constant 0 : i32
    %c0_i32_1 = arith.constant 0 : i32
    return %c0_i32, %c0_i32_0 : i32, i32
  }
  func.func @transform_2(%arg0: i32) -> (i32, i32) {
    %c0_i32 = arith.constant 0 : i32
    %c0_i32_0 = arith.constant 0 : i32
    %c0_i32_1 = arith.constant 0 : i32
    return %c0_i32, %c0_i32_0 : i32, i32
  }
  func.func @transform_3(%arg0: i32) -> (i32, i32) {
    %c0_i32 = arith.constant 0 : i32
    %c0_i32_0 = arith.constant 0 : i32
    %c0_i32_1 = arith.constant 0 : i32
    return %c0_i32, %c0_i32_0 : i32, i32
  }
  func.func @transform_4(%arg0: i32) -> (i32, i32) {
    %c0_i32 = arith.constant 0 : i32
    %c0_i32_0 = arith.constant 0 : i32
    %c0_i32_1 = arith.constant 0 : i32
    return %c0_i32, %c0_i32_0 : i32, i32
  }
  func.func @transform_5(%arg0: i32) -> (i32, i32) {
    %c0_i32 = arith.constant 0 : i32
    %c0_i32_0 = arith.constant 0 : i32
    %c0_i32_1 = arith.constant 0 : i32
    return %c0_i32, %c0_i32_0 : i32, i32
  }
  func.func @transform_6(%arg0: i32) -> (i32, i32) {
    %c0_i32 = arith.constant 0 : i32
    %c0_i32_0 = arith.constant 0 : i32
    %c0_i32_1 = arith.constant 0 : i32
    return %c0_i32, %c0_i32_0 : i32, i32
  }
  func.func @transform_7(%arg0: i32) -> (i32, i32) {
    %c0_i32 = arith.constant 0 : i32
    %c0_i32_0 = arith.constant 0 : i32
    return %arg0, %c0_i32 : i32, i32
  }
}

module attributes {stable_mosaic.version = 11 : i64} {
  func.func @_fused_mlp_kernel(%arg0: i32, %arg1: memref<8x1024xf32, #tpu.memory_space<vmem>>, %arg2: memref<1024x384xbf16, #tpu.memory_space<vmem>>, %arg3: memref<1x384xf32, #tpu.memory_space<vmem>>, %arg4: memref<384x128xbf16, #tpu.memory_space<vmem>>, %arg5: memref<1x128xf32, #tpu.memory_space<vmem>>, %arg6: memref<128x128xbf16, #tpu.memory_space<vmem>>, %arg7: memref<1x128xf32, #tpu.memory_space<vmem>>, %arg8: memref<8x128xf32, #tpu.memory_space<vmem>>) attributes {dimension_semantics = [#tpu.dimension_semantics<parallel>], iteration_bounds = array<i64: 1>, scalar_prefetch = 0 : i64, scratch_operands = 0 : i64, tpu.core_type = #tpu.core_type<tc>, window_params = [{transform_indices = @transform_0, window_bounds = array<i64: 8, 1024>}, {pipeline_mode = #tpu.pipeline_mode<synchronous>, transform_indices = @transform_1, window_bounds = array<i64: 1024, 384>}, {pipeline_mode = #tpu.pipeline_mode<synchronous>, transform_indices = @transform_2, window_bounds = array<i64: 1, 384>}, {pipeline_mode = #tpu.pipeline_mode<synchronous>, transform_indices = @transform_3, window_bounds = array<i64: 384, 128>}, {pipeline_mode = #tpu.pipeline_mode<synchronous>, transform_indices = @transform_4, window_bounds = array<i64: 1, 128>}, {pipeline_mode = #tpu.pipeline_mode<synchronous>, transform_indices = @transform_5, window_bounds = array<i64: 128, 128>}, {pipeline_mode = #tpu.pipeline_mode<synchronous>, transform_indices = @transform_6, window_bounds = array<i64: 1, 128>}, {transform_indices = @transform_7, window_bounds = array<i64: 8, 128>}]} {
    %c0 = arith.constant 0 : index
    %c0_0 = arith.constant 0 : index
    %0 = vector.load %arg1[%c0, %c0_0] : memref<8x1024xf32, #tpu.memory_space<vmem>>, vector<8x1024xf32>
    %c0_1 = arith.constant 0 : index
    %c0_2 = arith.constant 0 : index
    %1 = vector.load %arg2[%c0_1, %c0_2] : memref<1024x384xbf16, #tpu.memory_space<vmem>>, vector<1024x384xbf16>
    %c0_3 = arith.constant 0 : index
    %c0_4 = arith.constant 0 : index
    %2 = vector.load %arg3[%c0_3, %c0_4] : memref<1x384xf32, #tpu.memory_space<vmem>>, vector<1x384xf32>
    %3 = arith.truncf %0 : vector<8x1024xf32> to vector<8x1024xbf16>
    %cst = arith.constant dense<0.000000e+00> : vector<8x384xf32>
    %4 = tpu.matmul %3, %1, %cst {dimension_numbers = #tpu.dot_dimension_numbers<[1], [0], [0], [1], [0, 0, 1, 1], [], []>} : vector<8x1024xbf16>, vector<1024x384xbf16>, vector<8x384xf32> -> vector<8x384xf32>
    %5 = vector.broadcast %2 : vector<1x384xf32> to vector<8x384xf32>
    %6 = arith.addf %4, %5 : vector<8x384xf32>
    %cst_5 = arith.constant 0.000000e+00 : f32
    %7 = vector.broadcast %cst_5 : f32 to vector<8x384xf32>
    %8 = arith.maximumf %6, %7 : vector<8x384xf32>
    %c0_6 = arith.constant 0 : index
    %c0_7 = arith.constant 0 : index
    %9 = vector.load %arg4[%c0_6, %c0_7] : memref<384x128xbf16, #tpu.memory_space<vmem>>, vector<384x128xbf16>
    %c0_8 = arith.constant 0 : index
    %c0_9 = arith.constant 0 : index
    %10 = vector.load %arg5[%c0_8, %c0_9] : memref<1x128xf32, #tpu.memory_space<vmem>>, vector<1x128xf32>
    %11 = arith.truncf %8 : vector<8x384xf32> to vector<8x384xbf16>
    %cst_10 = arith.constant dense<0.000000e+00> : vector<8x128xf32>
    %12 = tpu.matmul %11, %9, %cst_10 {dimension_numbers = #tpu.dot_dimension_numbers<[1], [0], [0], [1], [0, 0, 1, 1], [], []>} : vector<8x384xbf16>, vector<384x128xbf16>, vector<8x128xf32> -> vector<8x128xf32>
    %13 = vector.broadcast %10 : vector<1x128xf32> to vector<8x128xf32>
    %14 = arith.addf %12, %13 : vector<8x128xf32>
    %cst_11 = arith.constant 0.000000e+00 : f32
    %15 = vector.broadcast %cst_11 : f32 to vector<8x128xf32>
    %16 = arith.maximumf %14, %15 : vector<8x128xf32>
    %c0_12 = arith.constant 0 : index
    %c0_13 = arith.constant 0 : index
    %17 = vector.load %arg6[%c0_12, %c0_13] : memref<128x128xbf16, #tpu.memory_space<vmem>>, vector<128x128xbf16>
    %c0_14 = arith.constant 0 : index
    %c0_15 = arith.constant 0 : index
    %18 = vector.load %arg7[%c0_14, %c0_15] : memref<1x128xf32, #tpu.memory_space<vmem>>, vector<1x128xf32>
    %19 = arith.truncf %16 : vector<8x128xf32> to vector<8x128xbf16>
    %cst_16 = arith.constant dense<0.000000e+00> : vector<8x128xf32>
    %20 = tpu.matmul %19, %17, %cst_16 {dimension_numbers = #tpu.dot_dimension_numbers<[1], [0], [0], [1], [0, 0, 1, 1], [], []>} : vector<8x128xbf16>, vector<128x128xbf16>, vector<8x128xf32> -> vector<8x128xf32>
    %21 = vector.broadcast %18 : vector<1x128xf32> to vector<8x128xf32>
    %22 = arith.addf %20, %21 : vector<8x128xf32>
    %cst_17 = arith.constant 0.000000e+00 : f32
    %23 = vector.broadcast %cst_17 : f32 to vector<8x128xf32>
    %24 = arith.maximumf %22, %23 : vector<8x128xf32>
    %c0_18 = arith.constant 0 : index
    %c0_19 = arith.constant 0 : index
    %25 = vector.load %arg8[%c0_18, %c0_19] : memref<8x128xf32, #tpu.memory_space<vmem>>, vector<8x128xf32>
    tpu.vector_store %arg8[%c0_18, %c0_19], %24 {strides = array<i32>} : memref<8x128xf32, #tpu.memory_space<vmem>>, vector<8x128xf32>,
    return
  }
  func.func @transform_0(%arg0: i32) -> (i32, i32) {
    %c0_i32 = arith.constant 0 : i32
    %c0_i32_0 = arith.constant 0 : i32
    return %arg0, %c0_i32 : i32, i32
  }
  func.func @transform_1(%arg0: i32) -> (i32, i32) {
    %c0_i32 = arith.constant 0 : i32
    %c0_i32_0 = arith.constant 0 : i32
    %c0_i32_1 = arith.constant 0 : i32
    return %c0_i32, %c0_i32_0 : i32, i32
  }
  func.func @transform_2(%arg0: i32) -> (i32, i32) {
    %c0_i32 = arith.constant 0 : i32
    %c0_i32_0 = arith.constant 0 : i32
    %c0_i32_1 = arith.constant 0 : i32
    return %c0_i32, %c0_i32_0 : i32, i32
  }
  func.func @transform_3(%arg0: i32) -> (i32, i32) {
    %c0_i32 = arith.constant 0 : i32
    %c0_i32_0 = arith.constant 0 : i32
    %c0_i32_1 = arith.constant 0 : i32
    return %c0_i32, %c0_i32_0 : i32, i32
  }
  func.func @transform_4(%arg0: i32) -> (i32, i32) {
    %c0_i32 = arith.constant 0 : i32
    %c0_i32_0 = arith.constant 0 : i32
    %c0_i32_1 = arith.constant 0 : i32
    return %c0_i32, %c0_i32_0 : i32, i32
  }
  func.func @transform_5(%arg0: i32) -> (i32, i32) {
    %c0_i32 = arith.constant 0 : i32
    %c0_i32_0 = arith.constant 0 : i32
    %c0_i32_1 = arith.constant 0 : i32
    return %c0_i32, %c0_i32_0 : i32, i32
  }
  func.func @transform_6(%arg0: i32) -> (i32, i32) {
    %c0_i32 = arith.constant 0 : i32
    %c0_i32_0 = arith.constant 0 : i32
    %c0_i32_1 = arith.constant 0 : i32
    return %c0_i32, %c0_i32_0 : i32, i32
  }
  func.func @transform_7(%arg0: i32) -> (i32, i32) {
    %c0_i32 = arith.constant 0 : i32
    %c0_i32_0 = arith.constant 0 : i32
    return %arg0, %c0_i32 : i32, i32
  }
}

</mosaic_0001>

<bundles_post_ra>
// kernel: forward.1
= control target key start
LH: loop header
LB: loop body
LE: loop exit
PB: predicated region body
PF: predicated region fallthrough
CT: control target
= control target key end

     0   :  { %12 = vsyncpa [#allocation3], 0  ;;  %s3046_s0 = inlined_call_operand.vmem [shape: f32[8,1024], index: 0, kind: input, shape index: {}]   ;;  %s3047_s1 = inlined_call_operand.hbm [shape: bf16[1024,384], index: 1, kind: input, shape index: {}]   ;;  %s3048_s2 = inlined_call_operand.vmem [shape: f32[1,384], index: 2, kind: input, shape index: {}]   ;;  %s3049_s3 = inlined_call_operand.vmem [shape: bf16[384,128], index: 3, kind: input, shape index: {}]   ;;  %s3050_s4 = inlined_call_operand.vmem [shape: f32[1,128], index: 4, kind: input, shape index: {}]   ;;  %s3051_s5 = inlined_call_operand.hbm [shape: bf16[128,128], index: 5, kind: input, shape index: {}]   ;;  %s3052_s6 = inlined_call_operand.vmem [shape: f32[1,128], index: 6, kind: input, shape index: {}]   ;;  %s3053_s7 = inlined_call_operand.vmem [shape: f32[8,128], index: 7, kind: output, shape index: {}]  }
   0x1   :  { %13 = vsyncpa [#allocation5], 0  ;;  %s2832_s24 = smov [#allocation2]  }
   0x2   :  { %s21_s25 = sshll.u32 %s2832_s24, 4  ;;  %s22_s25 = int_to_ptr.vmem [resolvable:$true] %s21_s25 }
   0x3   :  { %s2796_s26 = scalar_lea.vmem %s22_s25, 24576  ;;  %p2801_p1 = scmp.lt.s32.totalorder %s22_s25, %s22_s25 }
   0x4   :  { %p2797_p0 = scmp.ne.s32.totalorder %s22_s25, %s2796_s26  ;;  %p2802_p2 = scmp.lt.s32.totalorder %s2796_s26, %s2796_s26 }
   0x6   :  { %p2803_p3 = por %p2802_p2, %p2801_p1 }
   0x8   :  { %p2804_p4 = pnand %p2803_p3, %p2797_p0 }
   0xa   :  { %2807 = shalt.err (!%p2804_p4)
}
   0xb   :  { %s2833_s27 = smov 192   ;;  %s2834_s28 = smov 12  }
   0xc   :  { %27 = dma.hbm_to_vmem [thread:$0]  %s3047_s1, 24576, %s22_s25, [#allocation3], %s2833_s27, %s2833_s27, %s2834_s28  }
   0xd   :  { %s2835_s8 = smov [#allocation4]  }
   0xe   :  { %s39_s9 = sshll.u32 %s2835_s8, 4  ;;  %s40_s9 = int_to_ptr.vmem [resolvable:$true] %s39_s9 }
   0xf   :  { %s2816_s10 = scalar_lea.vmem %s40_s9, 1024  ;;  %p2821_p6 = scmp.lt.s32.totalorder %s40_s9, %s40_s9 }
  0x10   :  { %p2817_p5 = scmp.ne.s32.totalorder %s40_s9, %s2816_s10  ;;  %p2822_p7 = scmp.lt.s32.totalorder %s2816_s10, %s2816_s10 }
  0x12   :  { %p2823_p8 = por %p2822_p7, %p2821_p6 }
  0x14   :  { %p2824_p9 = pnand %p2823_p8, %p2817_p5 }
  0x16   :  { %2827 = shalt.err (!%p2824_p9)
}
  0x17   :  { %s2836_s11 = smov 64   ;;  %s2837_s12 = smov 4  }
  0x18   :  { %45 = dma.hbm_to_vmem [thread:$0]  %s3051_s5, 1024, %s40_s9, [#allocation5], %s2836_s11, %s2836_s11, %s2837_s12  }
  0x19   :  { %2828 = dma.done.wait [#allocation3], 24576  }
  0x1a   :  { %2829 = vsyncadd [#allocation3], 4294942720 }
  0x1b   :  { %2830 = dma.done.wait [#allocation5], 1024  }
  0x1c   :  { %2831 = vsyncadd [#allocation5], 4294966272  ;;  %v2500_v0 = vld [vmem:[#allocation2 + $0xac] ss:$12 sps:$4 sm:$0xff]   ;;  %v2504_v2 = vld [vmem:[#allocation2 + $0xa8] ss:$12 sps:$4 sm:$0xff]  }
  0x1d   :  { %v2502_v1 = vld [vmem:[#allocation2 + $0x22c] ss:$12 sps:$4 sm:$0xff]   ;;  %1368 = vmatprep.subr.bf16.mxu0 %v2500_v0  ;;  %v2505_v3 = vld [vmem:[#allocation2 + $0x228] ss:$12 sps:$4 sm:$0xff]   ;;  %v2510_v6 = vld [vmem:[#allocation2 + $0x90] ss:$12 sps:$4 sm:$0xff]  }
  0x1e   :  { %1409 = vmatprep.subr.bf16.mxu1 %v2502_v1  ;;  %v2506_v4 = vld [vmem:[#allocation2 + $0x94] ss:$12 sps:$4 sm:$0xff]   ;;  %1369 = vmatpush1.bf16.msra.mxu0 %v2504_v2  ;;  %v2511_v7 = vld [vmem:[#allocation2 + $0x210] ss:$12 sps:$4 sm:$0xff]   ;;  %v2516_v10 = vld [vmem:[#allocation2 + $0x78] ss:$12 sps:$4 sm:$0xff]  }
  0x1f   :  { %1410 = vmatpush1.bf16.msra.mxu1 %v2505_v3  ;;  %v2508_v5 = vld [vmem:[#allocation2 + $0x214] ss:$12 sps:$4 sm:$0xff]   ;;  %1370 = vmatprep.subr.bf16.mxu0 %v2506_v4  ;;  %v2512_v8 = vld [vmem:[#allocation2 + $0x7c] ss:$12 sps:$4 sm:$0xff]   ;;  %v2517_v11 = vld [vmem:[#allocation2 + $0x1f8] ss:$12 sps:$4 sm:$0xff]  }
  0x20   :  { %1411 = vmatprep.subr.bf16.mxu1 %v2508_v5  ;;  %v2514_v9 = vld [vmem:[#allocation2 + $0x1fc] ss:$12 sps:$4 sm:$0xff]   ;;  %v2518_v12 = vld [vmem:[#allocation2 + $0x64] ss:$12 sps:$4 sm:$0xff]   ;;  %v2522_v14 = vld [vmem:[#allocation2 + $0x60] ss:$12 sps:$4 sm:$0xff]  }
  0x21   :  { %v2520_v13 = vld [vmem:[#allocation2 + $0x1e4] ss:$12 sps:$4 sm:$0xff]   ;;  %v2523_v15 = vld [vmem:[#allocation2 + $0x1e0] ss:$12 sps:$4 sm:$0xff]   ;;  %v2528_v18 = vld [vmem:[#allocation2 + $0x48] ss:$12 sps:$4 sm:$0xff]  }
  0x22   :  { %1371 = vmatpush1.bf16.msra.mxu0 %v2510_v6  ;;  %v2524_v16 = vld [vmem:[#allocation2 + $0x4c] ss:$12 sps:$4 sm:$0xff]   ;;  %v2529_v19 = vld [vmem:[#allocation2 + $0x1c8] ss:$12 sps:$4 sm:$0xff]   ;;  %v2534_v22 = vld [vmem:[#allocation2 + $0x30] ss:$12 sps:$4 sm:$0xff]  }
  0x23   :  { %1412 = vmatpush1.bf16.msra.mxu1 %v2511_v7  ;;  %1372 = vmatprep.subr.bf16.mxu0 %v2512_v8  ;;  %v2526_v17 = vld [vmem:[#allocation2 + $0x1cc] ss:$12 sps:$4 sm:$0xff]   ;;  %v2530_v20 = vld [vmem:[#allocation2 + $0x34] ss:$12 sps:$4 sm:$0xff]   ;;  %v2535_v23 = vld [vmem:[#allocation2 + $0x1b0] ss:$12 sps:$4 sm:$0xff]  }
  0x24   :  { %1413 = vmatprep.subr.bf16.mxu1 %v2514_v9  ;;  %v2532_v21 = vld [vmem:[#allocation2 + $0x1b4] ss:$12 sps:$4 sm:$0xff]   ;;  %v2536_v24 = vld [vmem:[#allocation2 + $0x1c] ss:$12 sps:$4 sm:$0xff]   ;;  %v2540_v26 = vld [vmem:[#allocation2 + $0x18] ss:$12 sps:$4 sm:$0xff]  }
  0x25   :  { %v2538_v25 = vld [vmem:[#allocation2 + $0x19c] ss:$12 sps:$4 sm:$0xff]   ;;  %v2541_v27 = vld [vmem:[#allocation2 + $0x198] ss:$12 sps:$4 sm:$0xff]   ;;  %v2546_v30 = vld [vmem:[#allocation2] ss:$12 sps:$4 sm:$0xff]  }
  0x26   :  { %1373 = vmatpush1.bf16.msra.mxu0 %v2516_v10  ;;  %v2542_v28 = vld [vmem:[#allocation2 + $0x4] ss:$12 sps:$4 sm:$0xff]   ;;  %v2547_v31 = vld [vmem:[#allocation2 + $0x180] ss:$12 sps:$4 sm:$0xff]   ;;  %v2552_v34 = vld [vmem:[#allocation2 + $0x168] ss:$12 sps:$4 sm:$0xff]  }
  0x27   :  { %1414 = vmatpush1.bf16.msra.mxu1 %v2517_v11  ;;  %1374 = vmatprep.subr.bf16.mxu0 %v2518_v12  ;;  %v2544_v29 = vld [vmem:[#allocation2 + $0x184] ss:$12 sps:$4 sm:$0xff]   ;;  %v2548_v32 = vld [vmem:[#allocation2 + $0x16c] ss:$12 sps:$4 sm:$0xff]   ;;  %v2553_v35 = vld [vmem:[#allocation2 + $0x2e8] ss:$12 sps:$4 sm:$0xff]  }
  0x28   :  { %1415 = vmatprep.subr.bf16.mxu1 %v2520_v13  ;;  %v2550_v33 = vld [vmem:[#allocation2 + $0x2ec] ss:$12 sps:$4 sm:$0xff]   ;;  %v2554_v36 = vld [vmem:[#allocation2 + $0x154] ss:$12 sps:$4 sm:$0xff]   ;;  %v2558_v38 = vld [vmem:[#allocation2 + $0x150] ss:$12 sps:$4 sm:$0xff]  }
  0x29   :  { %v2556_v37 = vld [vmem:[#allocation2 + $0x2d4] ss:$12 sps:$4 sm:$0xff]   ;;  %v2559_v39 = vld [vmem:[#allocation2 + $0x2d0] ss:$12 sps:$4 sm:$0xff]   ;;  %v2564_v42 = vld [vmem:[#allocation2 + $0x138] ss:$12 sps:$4 sm:$0xff]  }
  0x2a   :  { %1375 = vmatpush1.bf16.msra.mxu0 %v2522_v14  ;;  %v2560_v40 = vld [vmem:[#allocation2 + $0x13c] ss:$12 sps:$4 sm:$0xff]   ;;  %v2565_v43 = vld [vmem:[#allocation2 + $0x2b8] ss:$12 sps:$4 sm:$0xff]   ;;  %v2570_v47 = vld [vmem:[#allocation2 + $0x120] ss:$12 sps:$4 sm:$0xff]  }
  0x2b   :  { %1416 = vmatpush1.bf16.msra.mxu1 %v2523_v15  ;;  %1376 = vmatprep.subr.bf16.mxu0 %v2524_v16  ;;  %v2562_v41 = vld [vmem:[#allocation2 + $0x2bc] ss:$12 sps:$4 sm:$0xff]   ;;  %v2566_v44 = vld [vmem:[#allocation2 + $0x124] ss:$12 sps:$4 sm:$0xff]   ;;  %v2571_v48 = vld [vmem:[#allocation2 + $0x2a0] ss:$12 sps:$4 sm:$0xff]  }
  0x2c   :  { %1417 = vmatprep.subr.bf16.mxu1 %v2526_v17  ;;  %v2568_v45 = vld [vmem:[#allocation2 + $0x2a4] ss:$12 sps:$4 sm:$0xff]   ;;  %v56_v46 = vld [vmem:[%s3046_s0 + $0x8] sm:$0xff]  ;;  %v58_v50 = vld [vmem:[%s3046_s0 + $0x18] sm:$0xff]  ;;  %vm2839_vm0 = vmmov 0  }
  0x2d   :  { %v2889_v49 = vpack.c.bf16 %v56_v46, %v56_v46  ;;  %v2572_v51 = vld [vmem:[#allocation2 + $0x10c] ss:$12 sps:$4 sm:$0xff]   ;;  %v2894_v52 = vpack.c.bf16 %v58_v50, %v58_v50  ;;  %v2576_v54 = vld [vmem:[#allocation2 + $0x108] ss:$12 sps:$4 sm:$0xff]   ;;  %v2582_v58 = vld [vmem:[#allocation2 + $0xf0] ss:$12 sps:$4 sm:$0xff]  }
  0x2e   :  { %1377 = vmatpush1.bf16.msra.mxu0 %v2528_v18  ;;  %v2574_v53 = vld [vmem:[#allocation2 + $0x28c] ss:$12 sps:$4 sm:$0xff]   ;;  %v2577_v55 = vld [vmem:[#allocation2 + $0x288] ss:$12 sps:$4 sm:$0xff]   ;;  %v2583_v59 = vld [vmem:[#allocation2 + $0x270] ss:$12 sps:$4 sm:$0xff]  }
  0x2f   :  { %1418 = vmatpush1.bf16.msra.mxu1 %v2529_v19  ;;  %1378 = vmatprep.subr.bf16.mxu0 %v2530_v20  ;;  %v2578_v56 = vld [vmem:[#allocation2 + $0xf4] ss:$12 sps:$4 sm:$0xff]   ;;  %v2584_v60 = vld [vmem:[#allocation2 + $0xdc] ss:$12 sps:$4 sm:$0xff]   ;;  %v2588_v62 = vld [vmem:[#allocation2 + $0xd8] ss:$12 sps:$4 sm:$0xff]  }
  0x30   :  { %1419 = vmatprep.subr.bf16.mxu1 %v2532_v21  ;;  %1400 = vmatprep.mubr.bf16.mxu0 %v2889_v49  ;;  %v2580_v57 = vld [vmem:[#allocation2 + $0x274] ss:$12 sps:$4 sm:$0xff]   ;;  %v2586_v61 = vld [vmem:[#allocation2 + $0x25c] ss:$12 sps:$4 sm:$0xff]   ;;  %v2589_v63 = vld [vmem:[#allocation2 + $0x258] ss:$12 sps:$4 sm:$0xff]  }
  0x31   :  { %1441 = vmatprep.mubr.bf16.mxu1 %v2894_v52  ;;  %v2590_v0 = vld [vmem:[#allocation2 + $0xc4] ss:$12 sps:$4 sm:$0xff]   ;;  %v2594_v2 = vld [vmem:[#allocation2 + $0xc0] ss:$12 sps:$4 sm:$0xff]   ;;  %v2596_v10 = vld [vmem:[#allocation2 + $0x3a8] ss:$12 sps:$4 sm:$0xff]  }
  0x32   :  { %1379 = vmatpush1.bf16.msra.mxu0 %v2534_v22  ;;  %v2592_v1 = vld [vmem:[#allocation2 + $0x244] ss:$12 sps:$4 sm:$0xff]   ;;  %v2595_v3 = vld [vmem:[#allocation2 + $0x240] ss:$12 sps:$4 sm:$0xff]   ;;  %v2599_v11 = vld [vmem:[#allocation2 + $0x528] ss:$12 sps:$4 sm:$0xff]  }
  0x33   :  { %1420 = vmatpush1.bf16.msra.mxu1 %v2535_v23  ;;  %1380 = vmatprep.subr.bf16.mxu0 %v2536_v24  ;;  %v55_v4 = vld [vmem:[%s3046_s0] sm:$0xff]  ;;  %v57_v5 = vld [vmem:[%s3046_s0 + $0x10] sm:$0xff]  ;;  %v2598_v6 = vld [vmem:[#allocation2 + $0x3ac] ss:$12 sps:$4 sm:$0xff]  }
  0x34   :  { %1421 = vmatprep.subr.bf16.mxu1 %v2538_v25  ;;  %v2601_v7 = vld [vmem:[#allocation2 + $0x52c] ss:$12 sps:$4 sm:$0xff]   ;;  %v2904_v8 = vpack.c.bf16 %v55_v4, %v55_v4  ;;  %v2906_v9 = vpack.c.bf16 %v57_v5, %v57_v5  ;;  %v2604_v12 = vld [vmem:[#allocation2 + $0x394] ss:$12 sps:$4 sm:$0xff]   ;;  %v2602_v14 = vld [vmem:[#allocation2 + $0x390] ss:$12 sps:$4 sm:$0xff]  }
  0x35   :  { %v2607_v13 = vld [vmem:[#allocation2 + $0x514] ss:$12 sps:$4 sm:$0xff]   ;;  %v2605_v15 = vld [vmem:[#allocation2 + $0x510] ss:$12 sps:$4 sm:$0xff]   ;;  %v2608_v18 = vld [vmem:[#allocation2 + $0x378] ss:$12 sps:$4 sm:$0xff]  }
  0x36   :  { %1381 = vmatpush1.bf16.msra.mxu0 %v2540_v26  ;;  %v2610_v16 = vld [vmem:[#allocation2 + $0x37c] ss:$12 sps:$4 sm:$0xff]   ;;  %v2611_v19 = vld [vmem:[#allocation2 + $0x4f8] ss:$12 sps:$4 sm:$0xff]   ;;  %v2614_v22 = vld [vmem:[#allocation2 + $0x360] ss:$12 sps:$4 sm:$0xff]  }
  0x37   :  { %1422 = vmatpush1.bf16.msra.mxu1 %v2541_v27  ;;  %1382 = vmatprep.subr.bf16.mxu0 %v2542_v28  ;;  %v2613_v17 = vld [vmem:[#allocation2 + $0x4fc] ss:$12 sps:$4 sm:$0xff]   ;;  %v2616_v20 = vld [vmem:[#allocation2 + $0x364] ss:$12 sps:$4 sm:$0xff]   ;;  %v2617_v23 = vld [vmem:[#allocation2 + $0x4e0] ss:$12 sps:$4 sm:$0xff]  }
  0x38   :  { %1423 = vmatprep.subr.bf16.mxu1 %v2544_v29  ;;  %v2619_v21 = vld [vmem:[#allocation2 + $0x4e4] ss:$12 sps:$4 sm:$0xff]   ;;  %v2622_v24 = vld [vmem:[#allocation2 + $0x34c] ss:$12 sps:$4 sm:$0xff]   ;;  %v2620_v26 = vld [vmem:[#allocation2 + $0x348] ss:$12 sps:$4 sm:$0xff]  }
  0x39   :  { %v2625_v25 = vld [vmem:[#allocation2 + $0x4cc] ss:$12 sps:$4 sm:$0xff]   ;;  %v2623_v27 = vld [vmem:[#allocation2 + $0x4c8] ss:$12 sps:$4 sm:$0xff]   ;;  %v2674_v4 = vld [vmem:[#allocation2 + $0x3f0] ss:$12 sps:$4 sm:$0xff]  }
  0x3a   :  { %1383 = vmatpush1.bf16.msra.mxu0 %v2546_v30  ;;  %v2628_v28 = vld [vmem:[#allocation2 + $0x334] ss:$12 sps:$4 sm:$0xff]   ;;  %v2626_v30 = vld [vmem:[#allocation2 + $0x330] ss:$12 sps:$4 sm:$0xff]  }
  0x3b   :  { %1424 = vmatpush1.bf16.msra.mxu1 %v2547_v31  ;;  %1384 = vmatprep.subr.bf16.mxu0 %v2548_v32  ;;  %v2631_v29 = vld [vmem:[#allocation2 + $0x4b4] ss:$12 sps:$4 sm:$0xff]   ;;  %v2629_v31 = vld [vmem:[#allocation2 + $0x4b0] ss:$12 sps:$4 sm:$0xff]  }
  0x3c   :  { %1425 = vmatprep.subr.bf16.mxu1 %v2550_v33  ;;  %v2634_v32 = vld [vmem:[#allocation2 + $0x31c] ss:$12 sps:$4 sm:$0xff]   ;;  %v2655_v50 = vld [vmem:[#allocation2 + $0x5d4] ss:$12 sps:$4 sm:$0xff]  }
  0x3d   :  { %v2637_v33 = vld [vmem:[#allocation2 + $0x49c] ss:$12 sps:$4 sm:$0xff]  }
  0x3e   :  { %1385 = vmatpush2.bf16.msra.mxu0 %v2552_v34  ;;  %v60_v34 = vld [vmem:[%s3046_s0 + $0x28] sm:$0xff]  ;;  %v2677_v5 = vld [vmem:[#allocation2 + $0x570] ss:$12 sps:$4 sm:$0xff]  }
  0x3f   :  { %1426 = vmatpush2.bf16.msra.mxu1 %v2553_v35  ;;  %1386 = vmatprep.subr.bf16.mxu0 %v2554_v36  ;;  %v2632_v35 = vld [vmem:[#allocation2 + $0x318] ss:$12 sps:$4 sm:$0xff]   ;;  %v2644_v46 = vld [vmem:[#allocation2 + $0x468] ss:$12 sps:$4 sm:$0xff]  }
  0x40   :  { %1427 = vmatprep.subr.bf16.mxu1 %v2556_v37  ;;  %v2635_v36 = vld [vmem:[#allocation2 + $0x498] ss:$12 sps:$4 sm:$0xff]   ;;  %v2913_v37 = vpack.c.bf16 %v60_v34, %v60_v34  ;;  %v2706_v34 = vld [vmem:[#allocation2 + $0x68] ss:$12 sps:$4 sm:$0xff]  }
  0x42   :  { %1387 = vmatpush2.bf16.msra.mxu0 %v2558_v38  ;;  %v62_v38 = vld [vmem:[%s3046_s0 + $0x38] sm:$0xff] }
  0x43   :  { %1428 = vmatpush2.bf16.msra.mxu1 %v2559_v39  ;;  %1388 = vmatprep.subr.bf16.mxu0 %v2560_v40  ;;  %v2640_v39 = vld [vmem:[#allocation2 + $0x304] ss:$12 sps:$4 sm:$0xff]   ;;  %v2918_v40 = vpack.c.bf16 %v62_v38, %v62_v38 }
  0x44   :  { %1429 = vmatprep.subr.bf16.mxu1 %v2562_v41  ;;  %v2643_v41 = vld [vmem:[#allocation2 + $0x484] ss:$12 sps:$4 sm:$0xff]  }
  0x45   :  { %v2709_v38 = vld [vmem:[#allocation2 + $0x290] ss:$12 sps:$4 sm:$0xff]  }
  0x46   :  { %1389 = vmatpush2.bf16.msra.mxu0 %v2564_v42  ;;  %v2638_v42 = vld [vmem:[#allocation2 + $0x300] ss:$12 sps:$4 sm:$0xff]  }
  0x47   :  { %1430 = vmatpush2.bf16.msra.mxu1 %v2565_v43  ;;  %1390 = vmatprep.subr.bf16.mxu0 %v2566_v44  ;;  %v2641_v43 = vld [vmem:[#allocation2 + $0x480] ss:$12 sps:$4 sm:$0xff]  }
  0x48   :  { %1431 = vmatprep.subr.bf16.mxu1 %v2568_v45  ;;  %v2646_v44 = vld [vmem:[#allocation2 + $0x46c] ss:$12 sps:$4 sm:$0xff]  }
  0x49   :  { %v2649_v45 = vld [vmem:[#allocation2 + $0x5ec] ss:$12 sps:$4 sm:$0xff]  }
  0x4a   :  { %1391 = vmatpush2.bf16.msra.mxu0 %v2570_v47  ;;  %v2647_v47 = vld [vmem:[#allocation2 + $0x5e8] ss:$12 sps:$4 sm:$0xff]  }
  0x4b   :  { %1432 = vmatpush2.bf16.msra.mxu1 %v2571_v48  ;;  %1392 = vmatprep.subr.bf16.mxu0 %v2572_v51  ;;  %v2652_v48 = vld [vmem:[#allocation2 + $0x454] ss:$12 sps:$4 sm:$0xff]   ;;  %v2650_v51 = vld [vmem:[#allocation2 + $0x450] ss:$12 sps:$4 sm:$0xff]  }
  0x4c   :  { %1433 = vmatprep.subr.bf16.mxu1 %v2574_v53  ;;  %v2653_v53 = vld [vmem:[#allocation2 + $0x5d0] ss:$12 sps:$4 sm:$0xff]  }
  0x4e   :  { %1393 = vmatpush2.bf16.msra.mxu0 %v2576_v54  ;;  %v2658_v54 = vld [vmem:[#allocation2 + $0x43c] ss:$12 sps:$4 sm:$0xff]  }
  0x4f   :  { %1434 = vmatpush2.bf16.msra.mxu1 %v2577_v55  ;;  %1394 = vmatprep.subr.bf16.mxu0 %v2578_v56  ;;  %v2661_v55 = vld [vmem:[#allocation2 + $0x5bc] ss:$12 sps:$4 sm:$0xff]   ;;  %v2656_v56 = vld [vmem:[#allocation2 + $0x438] ss:$12 sps:$4 sm:$0xff]  }
  0x50   :  { %1435 = vmatprep.subr.bf16.mxu1 %v2580_v57  ;;  %v2659_v57 = vld [vmem:[#allocation2 + $0x5b8] ss:$12 sps:$4 sm:$0xff]  }
  0x52   :  { %1395 = vmatpush2.bf16.msra.mxu0 %v2582_v58  ;;  %v2664_v58 = vld [vmem:[#allocation2 + $0x424] ss:$12 sps:$4 sm:$0xff]  }
  0x53   :  { %1436 = vmatpush2.bf16.msra.mxu1 %v2583_v59  ;;  %1396 = vmatprep.subr.bf16.mxu0 %v2584_v60  ;;  %v2667_v59 = vld [vmem:[#allocation2 + $0x5a4] ss:$12 sps:$4 sm:$0xff]   ;;  %v2662_v60 = vld [vmem:[#allocation2 + $0x420] ss:$12 sps:$4 sm:$0xff]  }
  0x54   :  { %1437 = vmatprep.subr.bf16.mxu1 %v2586_v61  ;;  %v2665_v61 = vld [vmem:[#allocation2 + $0x5a0] ss:$12 sps:$4 sm:$0xff]  }
  0x56   :  { %1397 = vmatpush2.bf16.msra.mxu0 %v2588_v62  ;;  %v2670_v62 = vld [vmem:[#allocation2 + $0x40c] ss:$12 sps:$4 sm:$0xff]  }
  0x57   :  { %1438 = vmatpush2.bf16.msra.mxu1 %v2589_v63  ;;  %1398 = vmatprep.subr.bf16.mxu0 %v2590_v0  ;;  %v2673_v63 = vld [vmem:[#allocation2 + $0x58c] ss:$12 sps:$4 sm:$0xff]   ;;  %v2668_v0 = vld [vmem:[#allocation2 + $0x408] ss:$12 sps:$4 sm:$0xff]  }
  0x58   :  { %1439 = vmatprep.subr.bf16.mxu1 %v2592_v1  ;;  %v2671_v1 = vld [vmem:[#allocation2 + $0x588] ss:$12 sps:$4 sm:$0xff]  }
  0x5a   :  { %1399 = vmatpush2.bf16.msra.mxu0 %v2594_v2  ;;  %v2676_v2 = vld [vmem:[#allocation2 + $0x3f4] ss:$12 sps:$4 sm:$0xff]  }
  0x5b   :  { %1440 = vmatpush2.bf16.msra.mxu1 %v2595_v3  ;;  %1450 = vmatprep.subr.bf16.mxu0 %v2598_v6  ;;  %v2679_v3 = vld [vmem:[#allocation2 + $0x574] ss:$12 sps:$4 sm:$0xff]   ;;  %v2682_v6 = vld [vmem:[#allocation2 + $0x3dc] ss:$12 sps:$4 sm:$0xff]  }
  0x5c   :  { %1491 = vmatprep.subr.bf16.mxu1 %v2601_v7  ;;  %v2685_v7 = vld [vmem:[#allocation2 + $0x55c] ss:$12 sps:$4 sm:$0xff]  }
  0x5d   :  { %1401 = vmatmul.mubr.bf16.vlgmr.msra.gmra.mxu0 %v2904_v8 }
  0x5e   :  { %1442 = vmatmul.mubr.bf16.vlgmr.msra.gmra.mxu1 %v2906_v9  ;;  %1451 = vmatpush1.bf16.msra.mxu0 %v2596_v10  ;;  %v2680_v10 = vld [vmem:[#allocation2 + $0x3d8] ss:$12 sps:$4 sm:$0xff]  }
  0x5f   :  { %1492 = vmatpush1.bf16.msra.mxu1 %v2599_v11  ;;  %1452 = vmatprep.subr.bf16.mxu0 %v2604_v12  ;;  %v2683_v11 = vld [vmem:[#allocation2 + $0x558] ss:$12 sps:$4 sm:$0xff]  }
  0x60   :  { %1493 = vmatprep.subr.bf16.mxu1 %v2607_v13  ;;  %1482 = vmatprep.mubr.bf16.mxu0 %v2913_v37  ;;  %v2688_v12 = vld [vmem:[#allocation2 + $0x3c4] ss:$12 sps:$4 sm:$0xff]  }
  0x61   :  { %1523 = vmatprep.mubr.bf16.mxu1 %v2918_v40  ;;  %v2691_v13 = vld [vmem:[#allocation2 + $0x544] ss:$12 sps:$4 sm:$0xff]  }
  0x62   :  { %1453 = vmatpush1.bf16.msra.mxu0 %v2602_v14  ;;  %v2686_v14 = vld [vmem:[#allocation2 + $0x3c0] ss:$12 sps:$4 sm:$0xff]  }
  0x63   :  { %1494 = vmatpush1.bf16.msra.mxu1 %v2605_v15  ;;  %1454 = vmatprep.subr.bf16.mxu0 %v2610_v16  ;;  %v2689_v15 = vld [vmem:[#allocation2 + $0x540] ss:$12 sps:$4 sm:$0xff]  }
  0x64   :  { %1495 = vmatprep.subr.bf16.mxu1 %v2613_v17  ;;  %v59_v16 = vld [vmem:[%s3046_s0 + $0x20] sm:$0xff]  ;;  %v61_v17 = vld [vmem:[%s3046_s0 + $0x30] sm:$0xff] }
  0x66   :  { %1455 = vmatpush1.bf16.msra.mxu0 %v2608_v18  ;;  %v2692_v18 = vld [vmem:[#allocation2 + $0x170] ss:$12 sps:$4 sm:$0xff]  }
  0x67   :  { %1496 = vmatpush1.bf16.msra.mxu1 %v2611_v19  ;;  %1456 = vmatprep.subr.bf16.mxu0 %v2616_v20  ;;  %v2693_v19 = vld [vmem:[#allocation2 + $0x2f0] ss:$12 sps:$4 sm:$0xff]  }
  0x68   :  { %1497 = vmatprep.subr.bf16.mxu1 %v2619_v21  ;;  %v2694_v20 = vld [vmem:[#allocation2 + $0xb0] ss:$12 sps:$4 sm:$0xff]   ;;  %v2928_v21 = vpack.c.bf16 %v59_v16, %v59_v16  ;;  %v2752_v16 = vld [vmem:[#allocation2 + $0x3c8] ss:$12 sps:$4 sm:$0xff]  }
  0x6a   :  { %1457 = vmatpush1.bf16.msra.mxu0 %v2614_v22  ;;  %v2930_v22 = vpack.c.bf16 %v61_v17, %v61_v17  ;;  %v2753_v17 = vld [vmem:[#allocation2 + $0x548] ss:$12 sps:$4 sm:$0xff]  }
  0x6b   :  { %1498 = vmatpush1.bf16.msra.mxu1 %v2617_v23  ;;  %1458 = vmatprep.subr.bf16.mxu0 %v2622_v24  ;;  %v2695_v23 = vld [vmem:[#allocation2 + $0x230] ss:$12 sps:$4 sm:$0xff]   ;;  %v2696_v24 = vld [vmem:[#allocation2 + $0x158] ss:$12 sps:$4 sm:$0xff]  }
  0x6c   :  { %1499 = vmatprep.subr.bf16.mxu1 %v2625_v25  ;;  %v2697_v25 = vld [vmem:[#allocation2 + $0x2d8] ss:$12 sps:$4 sm:$0xff]  }
  0x6e   :  { %1459 = vmatpush1.bf16.msra.mxu0 %v2620_v26  ;;  %v2698_v26 = vld [vmem:[#allocation2 + $0x98] ss:$12 sps:$4 sm:$0xff]  }
  0x6f   :  { %1500 = vmatpush1.bf16.msra.mxu1 %v2623_v27  ;;  %1460 = vmatprep.subr.bf16.mxu0 %v2628_v28  ;;  %v2699_v27 = vld [vmem:[#allocation2 + $0x218] ss:$12 sps:$4 sm:$0xff]   ;;  %v2700_v28 = vld [vmem:[#allocation2 + $0x140] ss:$12 sps:$4 sm:$0xff]  }
  0x70   :  { %1501 = vmatprep.subr.bf16.mxu1 %v2631_v29  ;;  %v2701_v29 = vld [vmem:[#allocation2 + $0x2c0] ss:$12 sps:$4 sm:$0xff]  }
  0x72   :  { %1461 = vmatpush1.bf16.msra.mxu0 %v2626_v30  ;;  %v2702_v30 = vld [vmem:[#allocation2 + $0x80] ss:$12 sps:$4 sm:$0xff]  }
  0x73   :  { %1502 = vmatpush1.bf16.msra.mxu1 %v2629_v31  ;;  %1462 = vmatprep.subr.bf16.mxu0 %v2634_v32  ;;  %v2703_v31 = vld [vmem:[#allocation2 + $0x200] ss:$12 sps:$4 sm:$0xff]   ;;  %v2704_v32 = vld [vmem:[#allocation2 + $0x128] ss:$12 sps:$4 sm:$0xff]  }
  0x74   :  { %1503 = vmatprep.subr.bf16.mxu1 %v2637_v33  ;;  %v2705_v33 = vld [vmem:[#allocation2 + $0x2a8] ss:$12 sps:$4 sm:$0xff]  }
  0x76   :  { %1463 = vmatpush1.bf16.msra.mxu0 %v2632_v35  ;;  %v2707_v35 = vld [vmem:[#allocation2 + $0x1e8] ss:$12 sps:$4 sm:$0xff]  }
  0x77   :  { %1504 = vmatpush1.bf16.msra.mxu1 %v2635_v36  ;;  %1464 = vmatprep.subr.bf16.mxu0 %v2640_v39  ;;  %v2708_v36 = vld [vmem:[#allocation2 + $0x110] ss:$12 sps:$4 sm:$0xff]  }
  0x78   :  { %1505 = vmatprep.subr.bf16.mxu1 %v2643_v41  ;;  %v2710_v39 = vld [vmem:[#allocation2 + $0x50] ss:$12 sps:$4 sm:$0xff]  }
  0x79   :  { %v2711_v41 = vld [vmem:[#allocation2 + $0x1d0] ss:$12 sps:$4 sm:$0xff]  }
  0x7a   :  { %1465 = vmatpush1.bf16.msra.mxu0 %v2638_v42  ;;  %v2714_v42 = vld [vmem:[#allocation2 + $0x38] ss:$12 sps:$4 sm:$0xff]  }
  0x7b   :  { %1506 = vmatpush1.bf16.msra.mxu1 %v2641_v43  ;;  %1466 = vmatprep.subr.bf16.mxu0 %v2646_v44  ;;  %v2715_v43 = vld [vmem:[#allocation2 + $0x1b8] ss:$12 sps:$4 sm:$0xff]   ;;  %v2716_v44 = vld [vmem:[#allocation2 + $0xe0] ss:$12 sps:$4 sm:$0xff]  }
  0x7c   :  { %1507 = vmatprep.subr.bf16.mxu1 %v2649_v45  ;;  %v2717_v45 = vld [vmem:[#allocation2 + $0x260] ss:$12 sps:$4 sm:$0xff]  }
  0x7e   :  { %1467 = vmatpush2.bf16.msra.mxu0 %v2644_v46  ;;  %v2718_v46 = vld [vmem:[#allocation2 + $0x20] ss:$12 sps:$4 sm:$0xff]  }
  0x7f   :  { %1508 = vmatpush2.bf16.msra.mxu1 %v2647_v47  ;;  %1468 = vmatprep.subr.bf16.mxu0 %v2652_v48  ;;  %v2719_v47 = vld [vmem:[#allocation2 + $0x1a0] ss:$12 sps:$4 sm:$0xff]   ;;  %v2720_v48 = vld [vmem:[#allocation2 + $0xc8] ss:$12 sps:$4 sm:$0xff]  }
  0x80   :  { %1509 = vmatprep.subr.bf16.mxu1 %v2655_v50  ;;  %v2721_v50 = vld [vmem:[#allocation2 + $0x248] ss:$12 sps:$4 sm:$0xff]  }
  0x82   :  { %1469 = vmatpush2.bf16.msra.mxu0 %v2650_v51  ;;  %v2722_v51 = vld [vmem:[#allocation2 + $0x8] ss:$12 sps:$4 sm:$0xff]  }
  0x83   :  { %1510 = vmatpush2.bf16.msra.mxu1 %v2653_v53  ;;  %1470 = vmatprep.subr.bf16.mxu0 %v2658_v54  ;;  %v2723_v53 = vld [vmem:[#allocation2 + $0x188] ss:$12 sps:$4 sm:$0xff]   ;;  %v2724_v54 = vld [vmem:[#allocation2 + $0x470] ss:$12 sps:$4 sm:$0xff]  }
  0x84   :  { %1511 = vmatprep.subr.bf16.mxu1 %v2661_v55  ;;  %v2725_v55 = vld [vmem:[#allocation2 + $0x5f0] ss:$12 sps:$4 sm:$0xff]  }
  0x86   :  { %1471 = vmatpush2.bf16.msra.mxu0 %v2656_v56  ;;  %v2726_v56 = vld [vmem:[#allocation2 + $0x3b0] ss:$12 sps:$4 sm:$0xff]  }
  0x87   :  { %1512 = vmatpush2.bf16.msra.mxu1 %v2659_v57  ;;  %1472 = vmatprep.subr.bf16.mxu0 %v2664_v58  ;;  %v2727_v57 = vld [vmem:[#allocation2 + $0x530] ss:$12 sps:$4 sm:$0xff]   ;;  %v2728_v58 = vld [vmem:[#allocation2 + $0x458] ss:$12 sps:$4 sm:$0xff]  }
  0x88   :  { %1513 = vmatprep.subr.bf16.mxu1 %v2667_v59  ;;  %v2729_v59 = vld [vmem:[#allocation2 + $0x5d8] ss:$12 sps:$4 sm:$0xff]  }
  0x8a   :  { %1473 = vmatpush2.bf16.msra.mxu0 %v2662_v60  ;;  %v2730_v60 = vld [vmem:[#allocation2 + $0x398] ss:$12 sps:$4 sm:$0xff]  }
  0x8b   :  { %1514 = vmatpush2.bf16.msra.mxu1 %v2665_v61  ;;  %1474 = vmatprep.subr.bf16.mxu0 %v2670_v62  ;;  %v2731_v61 = vld [vmem:[#allocation2 + $0x518] ss:$12 sps:$4 sm:$0xff]   ;;  %v2732_v62 = vld [vmem:[#allocation2 + $0x440] ss:$12 sps:$4 sm:$0xff]  }
  0x8c   :  { %1515 = vmatprep.subr.bf16.mxu1 %v2673_v63  ;;  %v2733_v63 = vld [vmem:[#allocation2 + $0x5c0] ss:$12 sps:$4 sm:$0xff]  }
  0x8e   :  { %1475 = vmatpush2.bf16.msra.mxu0 %v2668_v0  ;;  %v2734_v0 = vld [vmem:[#allocation2 + $0x380] ss:$12 sps:$4 sm:$0xff]  }
  0x8f   :  { %1516 = vmatpush2.bf16.msra.mxu1 %v2671_v1  ;;  %1476 = vmatprep.subr.bf16.mxu0 %v2676_v2  ;;  %v2735_v1 = vld [vmem:[#allocation2 + $0x500] ss:$12 sps:$4 sm:$0xff]   ;;  %v2736_v2 = vld [vmem:[#allocation2 + $0x428] ss:$12 sps:$4 sm:$0xff]  }
  0x90   :  { %1517 = vmatprep.subr.bf16.mxu1 %v2679_v3  ;;  %v2737_v3 = vld [vmem:[#allocation2 + $0x5a8] ss:$12 sps:$4 sm:$0xff]  }
  0x92   :  { %1477 = vmatpush2.bf16.msra.mxu0 %v2674_v4  ;;  %v2740_v4 = vld [vmem:[#allocation2 + $0x410] ss:$12 sps:$4 sm:$0xff]  }
  0x93   :  { %1518 = vmatpush2.bf16.msra.mxu1 %v2677_v5  ;;  %1478 = vmatprep.subr.bf16.mxu0 %v2682_v6  ;;  %v2741_v5 = vld [vmem:[#allocation2 + $0x590] ss:$12 sps:$4 sm:$0xff]  }
  0x94   :  { %1519 = vmatprep.subr.bf16.mxu1 %v2685_v7  ;;  %v2742_v6 = vld [vmem:[#allocation2 + $0x350] ss:$12 sps:$4 sm:$0xff]  }
  0x95   :  { %v2743_v7 = vld [vmem:[#allocation2 + $0x4d0] ss:$12 sps:$4 sm:$0xff]  }
  0x96   :  { %1479 = vmatpush2.bf16.msra.mxu0 %v2680_v10  ;;  %v2746_v10 = vld [vmem:[#allocation2 + $0x338] ss:$12 sps:$4 sm:$0xff]  }
  0x97   :  { %1520 = vmatpush2.bf16.msra.mxu1 %v2683_v11  ;;  %1480 = vmatprep.subr.bf16.mxu0 %v2688_v12  ;;  %v2747_v11 = vld [vmem:[#allocation2 + $0x4b8] ss:$12 sps:$4 sm:$0xff]   ;;  %v2748_v12 = vld [vmem:[#allocation2 + $0x3e0] ss:$12 sps:$4 sm:$0xff]  }
  0x98   :  { %1521 = vmatprep.subr.bf16.mxu1 %v2691_v13  ;;  %v2749_v13 = vld [vmem:[#allocation2 + $0x560] ss:$12 sps:$4 sm:$0xff]  }
  0x9a   :  { %1481 = vmatpush2.bf16.msra.mxu0 %v2686_v14  ;;  %v2750_v14 = vld [vmem:[#allocation2 + $0x320] ss:$12 sps:$4 sm:$0xff]  }
  0x9b   :  { %1522 = vmatpush2.bf16.msra.mxu1 %v2689_v15  ;;  %2324 = vmatprep.subr.bf16.mxu0 %v2692_v18  ;;  %v2751_v15 = vld [vmem:[#allocation2 + $0x4a0] ss:$12 sps:$4 sm:$0xff]   ;;  %v2754_v18 = vld [vmem:[#allocation2 + $0x308] ss:$12 sps:$4 sm:$0xff]  }
  0x9c   :  { %2346 = vmatprep.subr.bf16.mxu1 %v2693_v19  ;;  %v2755_v19 = vld [vmem:[#allocation2 + $0x488] ss:$12 sps:$4 sm:$0xff]  }
  0x9d   :  { %1483 = vmatmul.mubr.bf16.vlgmr.msra.gmra.mxu0 %v2928_v21 }
  0x9e   :  { %1524 = vmatmul.mubr.bf16.vlgmr.msra.gmra.mxu1 %v2930_v22  ;;  %2325 = vmatpush3.bf16.msra.mxu0 %v2694_v20  ;;  %v2756_v20 = vld [vmem:[%s3049_s3 + $0x78] sm:$0xff]  }
  0x9f   :  { %2347 = vmatpush3.bf16.msra.mxu1 %v2695_v23  ;;  %2326 = vmatprep.subr.bf16.mxu0 %v2696_v24  ;;  %v2757_v23 = vld [vmem:[%s3049_s3 + $0x38] sm:$0xff]   ;;  %v2758_v24 = vld [vmem:[%s3049_s3 + $0x70] sm:$0xff]  }
  0xa0   :  { %2348 = vmatprep.subr.bf16.mxu1 %v2697_v25  ;;  %1564 = vmatprep.mubr.bf16.mxu0 %v2889_v49  ;;  %v2712_v49 = vld [vmem:[#allocation2 + $0xf8] ss:$12 sps:$4 sm:$0xff]   ;;  %v2759_v25 = vld [vmem:[%s3049_s3 + $0x30] sm:$0xff]  }
  0xa1   :  { %1604 = vmatprep.mubr.bf16.mxu1 %v2894_v52  ;;  %v2713_v52 = vld [vmem:[#allocation2 + $0x278] ss:$12 sps:$4 sm:$0xff]  }
  0xa2   :  { %2327 = vmatpush3.bf16.msra.mxu0 %v2698_v26  ;;  %v2760_v26 = vld [vmem:[%s3049_s3 + $0x68] sm:$0xff]  }
  0xa3   :  { %2349 = vmatpush3.bf16.msra.mxu1 %v2699_v27  ;;  %2328 = vmatprep.subr.bf16.mxu0 %v2700_v28  ;;  %v2761_v27 = vld [vmem:[%s3049_s3 + $0x28] sm:$0xff]   ;;  %v2764_v28 = vld [vmem:[%s3049_s3 + $0x58] sm:$0xff]  }
  0xa4   :  { %2350 = vmatprep.subr.bf16.mxu1 %v2701_v29  ;;  %v2765_v29 = vld [vmem:[%s3049_s3 + $0x18] sm:$0xff]  }
  0xa6   :  { %2329 = vmatpush3.bf16.msra.mxu0 %v2702_v30  ;;  %v2766_v30 = vld [vmem:[%s3049_s3 + $0x50] sm:$0xff]  }
  0xa7   :  { %2351 = vmatpush3.bf16.msra.mxu1 %v2703_v31  ;;  %2330 = vmatprep.subr.bf16.mxu0 %v2704_v32  ;;  %v2767_v31 = vld [vmem:[%s3049_s3 + $0x10] sm:$0xff]   ;;  %v2768_v32 = vld [vmem:[%s3049_s3 + $0x48] sm:$0xff]  }
  0xa8   :  { %2352 = vmatprep.subr.bf16.mxu1 %v2705_v33  ;;  %v2769_v33 = vld [vmem:[%s3049_s3 + $0x8] sm:$0xff]  }
  0xaa   :  { %2331 = vmatpush3.bf16.msra.mxu0 %v2706_v34  ;;  %v2770_v34 = vld [vmem:[%s3049_s3 + $0x40] sm:$0xff]  }
  0xab   :  { %2353 = vmatpush3.bf16.msra.mxu1 %v2707_v35  ;;  %2332 = vmatprep.subr.bf16.mxu0 %v2708_v36  ;;  %v2771_v35 = vld [vmem:[%s3049_s3] sm:$0xff]   ;;  %v2772_v36 = vld [vmem:[%s3049_s3 + $0xb8] sm:$0xff]  }
  0xac   :  { %2354 = vmatprep.subr.bf16.mxu1 %v2709_v38  ;;  %v2838_v38 = vmov 0.0  }
  0xae   :  { %2333 = vmatpush3.bf16.msra.mxu0 %v2710_v39  ;;  %v2773_v39 = vld [vmem:[%s3049_s3 + $0xb0] sm:$0xff]  }
  0xaf   :  { %2355 = vmatpush3.bf16.msra.mxu1 %v2711_v41  ;;  %2334 = vmatprep.subr.bf16.mxu0 %v2712_v49  ;;  %v2774_v41 = vld [vmem:[%s3049_s3 + $0xa8] sm:$0xff]   ;;  %v2775_v49 = vld [vmem:[%s3049_s3 + $0xa0] sm:$0xff]  }
  0xb0   :  { %2356 = vmatprep.subr.bf16.mxu1 %v2713_v52  ;;  %v2776_v52 = vld [vmem:[%s3049_s3 + $0x98] sm:$0xff]  }
  0xb2   :  { %2335 = vmatpush3.bf16.msra.mxu0 %v2714_v42 }
  0xb3   :  { %2357 = vmatpush3.bf16.msra.mxu1 %v2715_v43  ;;  %2336 = vmatprep.subr.bf16.mxu0 %v2716_v44  ;;  %v2777_v44 = vld [vmem:[%s3049_s3 + $0x90] sm:$0xff]  }
  0xb4   :  { %2358 = vmatprep.subr.bf16.mxu1 %v2717_v45 }
  0xb6   :  { %2337 = vmatpush3.bf16.msra.mxu0 %v2718_v46 }
  0xb7   :  { %2359 = vmatpush3.bf16.msra.mxu1 %v2719_v47  ;;  %2338 = vmatprep.subr.bf16.mxu0 %v2720_v48 }
  0xb8   :  { %2360 = vmatprep.subr.bf16.mxu1 %v2721_v50  ;;  %v2778_v50 = vld [vmem:[%s3049_s3 + $0x88] sm:$0xff]  }
  0xba   :  { %2339 = vmatpush3.bf16.msra.mxu0 %v2722_v51 }
  0xbb   :  { %2361 = vmatpush3.bf16.msra.mxu1 %v2723_v53  ;;  %2368 = vmatprep.subr.bf16.mxu0 %v2724_v54  ;;  %v2779_v54 = vld [vmem:[%s3049_s3 + $0x80] sm:$0xff]  }
  0xbc   :  { %2390 = vmatprep.subr.bf16.mxu1 %v2725_v55  ;;  %v329_v55 = vlaneseq }
  0xbd   :  { %1565 = vmatmul.mubr.bf16.vlgmr.msra.gmra.mxu0 %v2904_v8  ;;  %v2738_v8 = vld [vmem:[#allocation2 + $0x368] ss:$12 sps:$4 sm:$0xff]  }
  0xbe   :  { %1605 = vmatmul.mubr.bf16.vlgmr.msra.gmra.mxu1 %v2906_v9  ;;  %2369 = vmatpush3.bf16.msra.mxu0 %v2726_v56  ;;  %v2739_v9 = vld [vmem:[#allocation2 + $0x4e8] ss:$12 sps:$4 sm:$0xff]   ;;  %v330_v56 = vshrl.u32 %v329_v55, 7 }
  0xbf   :  { %2391 = vmatpush3.bf16.msra.mxu1 %v2727_v57  ;;  %2370 = vmatprep.subr.bf16.mxu0 %v2728_v58  ;;  %v319_v58 = vld [vmem:[%s3048_s2] sm:$0x7] }
  0xc0   :  { %2392 = vmatprep.subr.bf16.mxu1 %v2729_v59  ;;  %1644 = vmatprep.mubr.bf16.mxu0 %v2913_v37  ;;  %v2744_v37 = vld [vmem:[#allocation2 + $0x3f8] ss:$12 sps:$4 sm:$0xff]   ;;  %v331_v57 = vsub.s32 0, %v330_v56  ;;  %v335_v59 = vsub.s32 1, %v330_v56 }
  0xc1   :  { %1684 = vmatprep.mubr.bf16.mxu1 %v2918_v40  ;;  %v2745_v40 = vld [vmem:[#allocation2 + $0x578] ss:$12 sps:$4 sm:$0xff]  }
  0xc2   :  { %2371 = vmatpush3.bf16.msra.mxu0 %v2730_v60  ;;  %v332_v60 = vrot.slane %v319_v58, %v331_v57 }
  0xc3   :  { %2393 = vmatpush3.bf16.msra.mxu1 %v2731_v61  ;;  %2372 = vmatprep.subr.bf16.mxu0 %v2732_v62  ;;  %v336_v61 = vrot.slane %v319_v58, %v335_v59 }
  0xc4   :  { %2394 = vmatprep.subr.bf16.mxu1 %v2733_v63 }
  0xc6   :  { %2373 = vmatpush3.bf16.msra.mxu0 %v2734_v0 }
  0xc7   :  { %2395 = vmatpush3.bf16.msra.mxu1 %v2735_v1  ;;  %2374 = vmatprep.subr.bf16.mxu0 %v2736_v2 }
  0xc8   :  { %2396 = vmatprep.subr.bf16.mxu1 %v2737_v3 }
  0xca   :  { %2375 = vmatpush3.bf16.msra.mxu0 %v2738_v8 }
  0xcb   :  { %2397 = vmatpush3.bf16.msra.mxu1 %v2739_v9  ;;  %2376 = vmatprep.subr.bf16.mxu0 %v2740_v4 }
  0xcc   :  { %2398 = vmatprep.subr.bf16.mxu1 %v2741_v5 }
  0xce   :  { %2377 = vmatpush3.bf16.msra.mxu0 %v2742_v6 }
  0xcf   :  { %2399 = vmatpush3.bf16.msra.mxu1 %v2743_v7  ;;  %2378 = vmatprep.subr.bf16.mxu0 %v2744_v37 }
  0xd0   :  { %2400 = vmatprep.subr.bf16.mxu1 %v2745_v40 }
  0xd2   :  { %2379 = vmatpush3.bf16.msra.mxu0 %v2746_v10 }
  0xd3   :  { %2401 = vmatpush3.bf16.msra.mxu1 %v2747_v11  ;;  %2380 = vmatprep.subr.bf16.mxu0 %v2748_v12 }
  0xd4   :  { %2402 = vmatprep.subr.bf16.mxu1 %v2749_v13 }
  0xd6   :  { %2381 = vmatpush3.bf16.msra.mxu0 %v2750_v14 }
  0xd7   :  { %2403 = vmatpush3.bf16.msra.mxu1 %v2751_v15  ;;  %2382 = vmatprep.subr.bf16.mxu0 %v2752_v16 }
  0xd8   :  { %2404 = vmatprep.subr.bf16.mxu1 %v2753_v17 }
  0xda   :  { %2383 = vmatpush3.bf16.msra.mxu0 %v2754_v18 }
  0xdb   :  { %2405 = vmatpush3.bf16.msra.mxu1 %v2755_v19  ;;  %2412 = vmatprep.subr.bf16.mxu0 %v2756_v20 }
  0xdc   :  { %2452 = vmatprep.subr.bf16.mxu1 %v2838_v38 }
  0xdd   :  { %1645 = vmatmul.mubr.bf16.vlgmr.msra.gmra.mxu0 %v2928_v21  ;;  %v2762_v21 = vld [vmem:[%s3049_s3 + $0x60] sm:$0xff]  }
  0xde   :  { %1685 = vmatmul.mubr.bf16.vlgmr.msra.gmra.mxu1 %v2930_v22  ;;  %2413 = vmatpush3.bf16.msra.mxu0 %v2757_v23  ;;  %v2763_v22 = vld [vmem:[%s3049_s3 + $0x20] sm:$0xff]  }
  0xdf   :  { %2414 = vmatprep.subr.bf16.mxu0 %v2758_v24  ;;  %2453 = vmatpush3.bf16.msra.mxu1 %v2772_v36 }
  0xe0   :  { %2454 = vmatprep.subr.bf16.mxu1 %v2838_v38  ;;  %2468 = vmatprep.mubr.msk.bf16.mxu1 %vm2839_vm0, %v2838_v38 }
  0xe2   :  { %2415 = vmatpush3.bf16.msra.mxu0 %v2759_v25 }
  0xe3   :  { %2416 = vmatprep.subr.bf16.mxu0 %v2760_v26  ;;  %2455 = vmatpush3.bf16.msra.mxu1 %v2773_v39  ;;  %v339_v26 = vsub.s32 2, %v330_v56 }
  0xe4   :  { %2456 = vmatprep.subr.bf16.mxu1 %v2838_v38 }
  0xe6   :  { %2417 = vmatpush3.bf16.msra.mxu0 %v2761_v27  ;;  %v340_v27 = vrot.slane %v319_v58, %v339_v26 }
  0xe7   :  { %2418 = vmatprep.subr.bf16.mxu0 %v2762_v21  ;;  %2457 = vmatpush3.bf16.msra.mxu1 %v2774_v41 }
  0xe8   :  { %2458 = vmatprep.subr.bf16.mxu1 %v2838_v38 }
  0xea   :  { %2419 = vmatpush3.bf16.msra.mxu0 %v2763_v22 }
  0xeb   :  { %2420 = vmatprep.subr.bf16.mxu0 %v2764_v28  ;;  %2459 = vmatpush3.bf16.msra.mxu1 %v2775_v49 }
  0xec   :  { %2460 = vmatprep.subr.bf16.mxu1 %v2838_v38 }
  0xee   :  { %2421 = vmatpush3.bf16.msra.mxu0 %v2765_v29 }
  0xef   :  { %2422 = vmatprep.subr.bf16.mxu0 %v2766_v30  ;;  %2461 = vmatpush3.bf16.msra.mxu1 %v2776_v52 }
  0xf0   :  { %2462 = vmatprep.subr.bf16.mxu1 %v2838_v38 }
  0xf2   :  { %2423 = vmatpush3.bf16.msra.mxu0 %v2767_v31 }
  0xf3   :  { %2424 = vmatprep.subr.bf16.mxu0 %v2768_v32  ;;  %2463 = vmatpush3.bf16.msra.mxu1 %v2777_v44 }
  0xf4   :  { %2464 = vmatprep.subr.bf16.mxu1 %v2838_v38 }
  0xf6   :  { %2425 = vmatpush3.bf16.msra.mxu0 %v2769_v33 }
  0xf7   :  { %2426 = vmatprep.subr.bf16.mxu0 %v2770_v34  ;;  %2465 = vmatpush3.bf16.msra.mxu1 %v2778_v50  ;;  %v2784_v50 = vld [vmem:[#allocation4 + $0x18] sm:$0xff]  }
  0xf8   :  { %2466 = vmatprep.subr.bf16.mxu1 %v2838_v38 }
  0xfa   :  { %2427 = vmatpush3.bf16.msra.mxu0 %v2771_v35 }
  0xfb   :  { %2472 = vmatprep.subr.bf16.mxu0 %v2838_v38  ;;  %2467 = vmatpush3.bf16.msra.mxu1 %v2779_v54  ;;  %v2787_v54 = vld [vmem:[#allocation4] sm:$0xff]  }
 0x11d   :  { %v1402_v42 = vpop.f32.mrf.mxu0 }
 0x11e   :  { %v1443_v43 = vpop.f32.mrf.mxu1  ;;  %v1403_v62 = vadd.f32 %v1402_v42, %v332_v60  ;;  %v2290_v60 = vld [vmem:[%s3050_s4] ss:$0 sm:$0xff] }
 0x11f   :  { %v1404_v45 = vpop.f32.mrf.mxu0 }
 0x120   :  { %v1445_v46 = vpop.f32.mrf.mxu1  ;;  %v1405_v63 = vadd.f32 %v1404_v45, %v336_v61  ;;  %v1444_v0 = vadd.f32 %v1443_v43, %v1403_v62  ;;  %v2780_v45 = vld [vmem:[#allocation4 + $0x38] sm:$0xff]  }
 0x121   :  { %v1406_v47 = vpop.f32.mrf.mxu0 }
 0x122   :  { %v1447_v48 = vpop.f32.mrf.mxu1  ;;  %v1446_v3 = vadd.f32 %v1445_v46, %v1405_v63  ;;  %v2781_v46 = vld [vmem:[#allocation4 + $0x30] sm:$0xff]   ;;  %v2782_v47 = vld [vmem:[#allocation4 + $0x28] sm:$0xff]  }
 0x123   :  { %v1407_v51 = vpop.f32.mrf.mxu0  ;;  %v2783_v48 = vld [vmem:[#allocation4 + $0x20] sm:$0xff]  }
 0x124   :  { %v1448_v53 = vpop.f32.mrf.mxu1  ;;  %v2785_v51 = vld [vmem:[#allocation4 + $0x10] sm:$0xff]  }
 0x125   :  { %v2786_v53 = vld [vmem:[#allocation4 + $0x8] sm:$0xff]  }
 0x15d   :  { %v1484_v1 = vpop.f32.mrf.mxu0 }
 0x15e   :  { %v1525_v2 = vpop.f32.mrf.mxu1  ;;  %v1485_v8 = vadd.f32 %v1484_v1, %v1444_v0 }
 0x15f   :  { %v1486_v9 = vpop.f32.mrf.mxu0 }
 0x160   :  { %v1527_v4 = vpop.f32.mrf.mxu1  ;;  %v1526_v5 = vadd.f32 %v1525_v2, %v1485_v8  ;;  %v1487_v6 = vadd.f32 %v1486_v9, %v1446_v3 }
 0x161   :  { %v1488_v7 = vpop.f32.mrf.mxu0 }
 0x162   :  { %v1529_v37 = vpop.f32.mrf.mxu1  ;;  %v1528_v40 = vadd.f32 %v1527_v4, %v1487_v6  ;;  %v1692_v10 = vmax.f32 %v1526_v5, 0.0 }
 0x163   :  { %v1489_v11 = vpop.f32.mrf.mxu0 }
 0x164   :  { %v1530_v12 = vpop.f32.mrf.mxu1  ;;  %v1693_v13 = vmax.f32 %v1528_v40, 0.0  ;;  %v1744_v15 = vpack.c.bf16 %v1692_v10, %v1692_v10 }
 0x166   :  { %v1745_v14 = vpack.c.bf16 %v1693_v13, %v1693_v13 }
 0x168   :  { %1929 = vmatprep.mubr.bf16.mxu0 %v1745_v14 }
 0x169   :  { %1930 = vmatmul.mubr.bf16.vlgmr.msra.gmra.mxu0 %v1744_v15 }
 0x16a   :  { %2488 = vmatprep.mubr.msk.bf16.mxu0 %vm2839_vm0, %v2838_v38  ;;  %2473 = vmatpush3.bf16.msra.mxu0 %v2780_v45 }
 0x16b   :  { %2474 = vmatprep.subr.bf16.mxu0 %v2838_v38 }
 0x16e   :  { %2475 = vmatpush3.bf16.msra.mxu0 %v2781_v46 }
 0x16f   :  { %2476 = vmatprep.subr.bf16.mxu0 %v2838_v38 }
 0x172   :  { %2477 = vmatpush3.bf16.msra.mxu0 %v2782_v47 }
 0x173   :  { %2478 = vmatprep.subr.bf16.mxu0 %v2838_v38 }
 0x176   :  { %2479 = vmatpush3.bf16.msra.mxu0 %v2783_v48 }
 0x177   :  { %2480 = vmatprep.subr.bf16.mxu0 %v2838_v38 }
 0x17a   :  { %2481 = vmatpush3.bf16.msra.mxu0 %v2784_v50 }
 0x17b   :  { %2482 = vmatprep.subr.bf16.mxu0 %v2838_v38 }
 0x17d   :  { %v2340_v16 = vpop.f32.mrf.mxu0 }
 0x17e   :  { %v2362_v17 = vpop.f32.mrf.mxu1  ;;  %2483 = vmatpush3.bf16.msra.mxu0 %v2785_v51 }
 0x17f   :  { %v2341_v18 = vpop.f32.mrf.mxu0  ;;  %2484 = vmatprep.subr.bf16.mxu0 %v2838_v38 }
 0x180   :  { %v2363_v19 = vpop.f32.mrf.mxu1  ;;  %v2342_v21 = vadd.f32 %v2341_v18, %v2340_v16 }
 0x181   :  { %v2343_v20 = vpop.f32.mrf.mxu0  ;;  %v2364_v28 = vadd.f32 %v2363_v19, %v2362_v17 }
 0x182   :  { %v2365_v23 = vpop.f32.mrf.mxu1  ;;  %v1567_v22 = vadd.f32 %v2342_v21, %v340_v27  ;;  %2485 = vmatpush3.bf16.msra.mxu0 %v2786_v53 }
 0x183   :  { %v2344_v24 = vpop.f32.mrf.mxu0  ;;  %2486 = vmatprep.subr.bf16.mxu0 %v2838_v38  ;;  %v2315_v38 = vld [vmem:[%s3052_s6] ss:$0 sm:$0xff] }
 0x184   :  { %v2366_v25 = vpop.f32.mrf.mxu1  ;;  %v1607_v33 = vadd.f32 %v2364_v28, %v1567_v22 }
 0x186   :  { %2487 = vmatpush3.bf16.msra.mxu0 %v2787_v54 }
 0x19d   :  { %v2384_v29 = vpop.f32.mrf.mxu0 }
 0x19e   :  { %v2406_v30 = vpop.f32.mrf.mxu1 }
 0x19f   :  { %v2385_v31 = vpop.f32.mrf.mxu0 }
 0x1a0   :  { %v2407_v32 = vpop.f32.mrf.mxu1  ;;  %v2386_v34 = vadd.f32 %v2385_v31, %v2384_v29 }
 0x1a1   :  { %v2387_v35 = vpop.f32.mrf.mxu0  ;;  %v2408_v41 = vadd.f32 %v2407_v32, %v2406_v30 }
 0x1a2   :  { %v2409_v36 = vpop.f32.mrf.mxu1  ;;  %v1647_v39 = vadd.f32 %v2386_v34, %v1607_v33 }
 0x1a3   :  { %v2388_v49 = vpop.f32.mrf.mxu0 }
 0x1a4   :  { %v2410_v52 = vpop.f32.mrf.mxu1  ;;  %v1687_v42 = vadd.f32 %v2408_v41, %v1647_v39 }
 0x1a6   :  { %v1694_v43 = vmax.f32 %v1687_v42, 0.0 }
 0x1a8   :  { %v1746_v44 = vpack.c.bf16 %v1694_v43, %v1694_v43 }
 0x1aa   :  { %2469 = vmatmul.mubr.bf16.vlgmr.msra.gmra.mxu1 %v1746_v44 }
 0x229   :  { %v2428_v55 = vpop.f32.mrf.mxu0 }
 0x22b   :  { %v2429_v56 = vpop.f32.mrf.mxu0 }
 0x22c   :  { %v2430_v59 = vadd.f32 %v2429_v56, %v2428_v55 }
 0x22d   :  { %v2431_v57 = vpop.f32.mrf.mxu0 }
 0x22e   :  { %v1932_v61 = vadd.f32 %v2430_v59, %v2290_v60 }
 0x22f   :  { %v2432_v58 = vpop.f32.mrf.mxu0 }
 0x26a   :  { %v1971_v62 = vpop.f32.mrf.mxu1 }
 0x26b   :  { %v1972_v63 = vadd.f32 %v1971_v62, %v1932_v61 }
 0x26c   :  { %v2470_v0 = vpop.f32.mrf.mxu1 }
 0x26d   :  { %v1977_v1 = vmax.f32 %v1972_v63, 0.0 }
 0x26e   :  { %v1974_v2 = vpop.f32.mrf.mxu1 }
 0x26f   :  { %v1995_v3 = vpack.c.bf16 %v1977_v1, %v1977_v1 }
 0x270   :  { %v2471_v8 = vpop.f32.mrf.mxu1 }
 0x271   :  { %2489 = vmatmul.mubr.bf16.vlgmr.msra.gmra.mxu0 %v1995_v3 }
 0x331   :  { %v2084_v9 = vpop.f32.mrf.mxu0 }
 0x332   :  { %v2085_v4 = vadd.f32 %v2315_v38, %v2084_v9 }
 0x333   :  { %v2490_v5 = vpop.f32.mrf.mxu0 }
 0x334   :  { %v2090_v6 = vmax.f32 %v2085_v4, 0.0 }
 0x335   :  { %v2087_v7 = vpop.f32.mrf.mxu0 }
 0x336   :  { %2091 = vst [vmem:[%s3053_s7] sm:$0xff] %v2090_v6 }
 0x337   :  { %v2491_v37 = vpop.f32.mrf.mxu0 }
 0x338   :  { %2096 = vsyncpa [#allocation3], 1 }
 0x339   :  { %2097 = vsyncpa [#allocation5], 1 }

// kernel: forward.1
= control target key start
LH: loop header
LB: loop body
LE: loop exit
PB: predicated region body
PF: predicated region fallthrough
CT: control target
= control target key end

     0   :  { %12 = vsyncpa [#allocation3], 0  ;;  %s3046_s0 = inlined_call_operand.vmem [shape: f32[8,1024], index: 0, kind: input, shape index: {}]   ;;  %s3047_s1 = inlined_call_operand.hbm [shape: bf16[1024,384], index: 1, kind: input, shape index: {}]   ;;  %s3048_s2 = inlined_call_operand.vmem [shape: f32[1,384], index: 2, kind: input, shape index: {}]   ;;  %s3049_s3 = inlined_call_operand.vmem [shape: bf16[384,128], index: 3, kind: input, shape index: {}]   ;;  %s3050_s4 = inlined_call_operand.vmem [shape: f32[1,128], index: 4, kind: input, shape index: {}]   ;;  %s3051_s5 = inlined_call_operand.hbm [shape: bf16[128,128], index: 5, kind: input, shape index: {}]   ;;  %s3052_s6 = inlined_call_operand.vmem [shape: f32[1,128], index: 6, kind: input, shape index: {}]   ;;  %s3053_s7 = inlined_call_operand.vmem [shape: f32[8,128], index: 7, kind: output, shape index: {}]  }
   0x1   :  { %13 = vsyncpa [#allocation5], 0  ;;  %s2832_s24 = smov [#allocation2]  }
   0x2   :  { %s21_s25 = sshll.u32 %s2832_s24, 4  ;;  %s22_s25 = int_to_ptr.vmem [resolvable:$true] %s21_s25 }
   0x3   :  { %s2796_s26 = scalar_lea.vmem %s22_s25, 24576  ;;  %p2801_p1 = scmp.lt.s32.totalorder %s22_s25, %s22_s25 }
   0x4   :  { %p2797_p0 = scmp.ne.s32.totalorder %s22_s25, %s2796_s26  ;;  %p2802_p2 = scmp.lt.s32.totalorder %s2796_s26, %s2796_s26 }
   0x6   :  { %p2803_p3 = por %p2802_p2, %p2801_p1 }
   0x8   :  { %p2804_p4 = pnand %p2803_p3, %p2797_p0 }
   0xa   :  { %2807 = shalt.err (!%p2804_p4)
}
   0xb   :  { %s2833_s27 = smov 192   ;;  %s2834_s28 = smov 12  }
   0xc   :  { %27 = dma.hbm_to_vmem [thread:$0]  %s3047_s1, 24576, %s22_s25, [#allocation3], %s2833_s27, %s2833_s27, %s2834_s28  }
   0xd   :  { %s2835_s8 = smov [#allocation4]  }
   0xe   :  { %s39_s9 = sshll.u32 %s2835_s8, 4  ;;  %s40_s9 = int_to_ptr.vmem [resolvable:$true] %s39_s9 }
   0xf   :  { %s2816_s10 = scalar_lea.vmem %s40_s9, 1024  ;;  %p2821_p6 = scmp.lt.s32.totalorder %s40_s9, %s40_s9 }
  0x10   :  { %p2817_p5 = scmp.ne.s32.totalorder %s40_s9, %s2816_s10  ;;  %p2822_p7 = scmp.lt.s32.totalorder %s2816_s10, %s2816_s10 }
  0x12   :  { %p2823_p8 = por %p2822_p7, %p2821_p6 }
  0x14   :  { %p2824_p9 = pnand %p2823_p8, %p2817_p5 }
  0x16   :  { %2827 = shalt.err (!%p2824_p9)
}
  0x17   :  { %s2836_s11 = smov 64   ;;  %s2837_s12 = smov 4  }
  0x18   :  { %45 = dma.hbm_to_vmem [thread:$0]  %s3051_s5, 1024, %s40_s9, [#allocation5], %s2836_s11, %s2836_s11, %s2837_s12  }
  0x19   :  { %2828 = dma.done.wait [#allocation3], 24576  }
  0x1a   :  { %2829 = vsyncadd [#allocation3], 4294942720 }
  0x1b   :  { %2830 = dma.done.wait [#allocation5], 1024  }
  0x1c   :  { %2831 = vsyncadd [#allocation5], 4294966272  ;;  %v2500_v0 = vld [vmem:[#allocation2 + $0xac] ss:$12 sps:$4 sm:$0xff]   ;;  %v2504_v2 = vld [vmem:[#allocation2 + $0xa8] ss:$12 sps:$4 sm:$0xff]  }
  0x1d   :  { %v2502_v1 = vld [vmem:[#allocation2 + $0x22c] ss:$12 sps:$4 sm:$0xff]   ;;  %1368 = vmatprep.subr.bf16.mxu0 %v2500_v0  ;;  %v2505_v3 = vld [vmem:[#allocation2 + $0x228] ss:$12 sps:$4 sm:$0xff]   ;;  %v2510_v6 = vld [vmem:[#allocation2 + $0x90] ss:$12 sps:$4 sm:$0xff]  }
  0x1e   :  { %1409 = vmatprep.subr.bf16.mxu1 %v2502_v1  ;;  %v2506_v4 = vld [vmem:[#allocation2 + $0x94] ss:$12 sps:$4 sm:$0xff]   ;;  %1369 = vmatpush1.bf16.msra.mxu0 %v2504_v2  ;;  %v2511_v7 = vld [vmem:[#allocation2 + $0x210] ss:$12 sps:$4 sm:$0xff]   ;;  %v2516_v10 = vld [vmem:[#allocation2 + $0x78] ss:$12 sps:$4 sm:$0xff]  }
  0x1f   :  { %1410 = vmatpush1.bf16.msra.mxu1 %v2505_v3  ;;  %v2508_v5 = vld [vmem:[#allocation2 + $0x214] ss:$12 sps:$4 sm:$0xff]   ;;  %1370 = vmatprep.subr.bf16.mxu0 %v2506_v4  ;;  %v2512_v8 = vld [vmem:[#allocation2 + $0x7c] ss:$12 sps:$4 sm:$0xff]   ;;  %v2517_v11 = vld [vmem:[#allocation2 + $0x1f8] ss:$12 sps:$4 sm:$0xff]  }
  0x20   :  { %1411 = vmatprep.subr.bf16.mxu1 %v2508_v5  ;;  %v2514_v9 = vld [vmem:[#allocation2 + $0x1fc] ss:$12 sps:$4 sm:$0xff]   ;;  %v2518_v12 = vld [vmem:[#allocation2 + $0x64] ss:$12 sps:$4 sm:$0xff]   ;;  %v2522_v14 = vld [vmem:[#allocation2 + $0x60] ss:$12 sps:$4 sm:$0xff]  }
  0x21   :  { %v2520_v13 = vld [vmem:[#allocation2 + $0x1e4] ss:$12 sps:$4 sm:$0xff]   ;;  %v2523_v15 = vld [vmem:[#allocation2 + $0x1e0] ss:$12 sps:$4 sm:$0xff]   ;;  %v2528_v18 = vld [vmem:[#allocation2 + $0x48] ss:$12 sps:$4 sm:$0xff]  }
  0x22   :  { %1371 = vmatpush1.bf16.msra.mxu0 %v2510_v6  ;;  %v2524_v16 = vld [vmem:[#allocation2 + $0x4c] ss:$12 sps:$4 sm:$0xff]   ;;  %v2529_v19 = vld [vmem:[#allocation2 + $0x1c8] ss:$12 sps:$4 sm:$0xff]   ;;  %v2534_v22 = vld [vmem:[#allocation2 + $0x30] ss:$12 sps:$4 sm:$0xff]  }
  0x23   :  { %1412 = vmatpush1.bf16.msra.mxu1 %v2511_v7  ;;  %1372 = vmatprep.subr.bf16.mxu0 %v2512_v8  ;;  %v2526_v17 = vld [vmem:[#allocation2 + $0x1cc] ss:$12 sps:$4 sm:$0xff]   ;;  %v2530_v20 = vld [vmem:[#allocation2 + $0x34] ss:$12 sps:$4 sm:$0xff]   ;;  %v2535_v23 = vld [vmem:[#allocation2 + $0x1b0] ss:$12 sps:$4 sm:$0xff]  }
  0x24   :  { %1413 = vmatprep.subr.bf16.mxu1 %v2514_v9  ;;  %v2532_v21 = vld [vmem:[#allocation2 + $0x1b4] ss:$12 sps:$4 sm:$0xff]   ;;  %v2536_v24 = vld [vmem:[#allocation2 + $0x1c] ss:$12 sps:$4 sm:$0xff]   ;;  %v2540_v26 = vld [vmem:[#allocation2 + $0x18] ss:$12 sps:$4 sm:$0xff]  }
  0x25   :  { %v2538_v25 = vld [vmem:[#allocation2 + $0x19c] ss:$12 sps:$4 sm:$0xff]   ;;  %v2541_v27 = vld [vmem:[#allocation2 + $0x198] ss:$12 sps:$4 sm:$0xff]   ;;  %v2546_v30 = vld [vmem:[#allocation2] ss:$12 sps:$4 sm:$0xff]  }
  0x26   :  { %1373 = vmatpush1.bf16.msra.mxu0 %v2516_v10  ;;  %v2542_v28 = vld [vmem:[#allocation2 + $0x4] ss:$12 sps:$4 sm:$0xff]   ;;  %v2547_v31 = vld [vmem:[#allocation2 + $0x180] ss:$12 sps:$4 sm:$0xff]   ;;  %v2552_v34 = vld [vmem:[#allocation2 + $0x168] ss:$12 sps:$4 sm:$0xff]  }
  0x27   :  { %1414 = vmatpush1.bf16.msra.mxu1 %v2517_v11  ;;  %1374 = vmatprep.subr.bf16.mxu0 %v2518_v12  ;;  %v2544_v29 = vld [vmem:[#allocation2 + $0x184] ss:$12 sps:$4 sm:$0xff]   ;;  %v2548_v32 = vld [vmem:[#allocation2 + $0x16c] ss:$12 sps:$4 sm:$0xff]   ;;  %v2553_v35 = vld [vmem:[#allocation2 + $0x2e8] ss:$12 sps:$4 sm:$0xff]  }
  0x28   :  { %1415 = vmatprep.subr.bf16.mxu1 %v2520_v13  ;;  %v2550_v33 = vld [vmem:[#allocation2 + $0x2ec] ss:$12 sps:$4 sm:$0xff]   ;;  %v2554_v36 = vld [vmem:[#allocation2 + $0x154] ss:$12 sps:$4 sm:$0xff]   ;;  %v2558_v38 = vld [vmem:[#allocation2 + $0x150] ss:$12 sps:$4 sm:$0xff]  }
  0x29   :  { %v2556_v37 = vld [vmem:[#allocation2 + $0x2d4] ss:$12 sps:$4 sm:$0xff]   ;;  %v2559_v39 = vld [vmem:[#allocation2 + $0x2d0] ss:$12 sps:$4 sm:$0xff]   ;;  %v2564_v42 = vld [vmem:[#allocation2 + $0x138] ss:$12 sps:$4 sm:$0xff]  }
  0x2a   :  { %1375 = vmatpush1.bf16.msra.mxu0 %v2522_v14  ;;  %v2560_v40 = vld [vmem:[#allocation2 + $0x13c] ss:$12 sps:$4 sm:$0xff]   ;;  %v2565_v43 = vld [vmem:[#allocation2 + $0x2b8] ss:$12 sps:$4 sm:$0xff]   ;;  %v2570_v47 = vld [vmem:[#allocation2 + $0x120] ss:$12 sps:$4 sm:$0xff]  }
  0x2b   :  { %1416 = vmatpush1.bf16.msra.mxu1 %v2523_v15  ;;  %1376 = vmatprep.subr.bf16.mxu0 %v2524_v16  ;;  %v2562_v41 = vld [vmem:[#allocation2 + $0x2bc] ss:$12 sps:$4 sm:$0xff]   ;;  %v2566_v44 = vld [vmem:[#allocation2 + $0x124] ss:$12 sps:$4 sm:$0xff]   ;;  %v2571_v48 = vld [vmem:[#allocation2 + $0x2a0] ss:$12 sps:$4 sm:$0xff]  }
  0x2c   :  { %1417 = vmatprep.subr.bf16.mxu1 %v2526_v17  ;;  %v2568_v45 = vld [vmem:[#allocation2 + $0x2a4] ss:$12 sps:$4 sm:$0xff]   ;;  %v56_v46 = vld [vmem:[%s3046_s0 + $0x8] sm:$0xff]  ;;  %v58_v50 = vld [vmem:[%s3046_s0 + $0x18] sm:$0xff]  ;;  %vm2839_vm0 = vmmov 0  }
  0x2d   :  { %v2889_v49 = vpack.c.bf16 %v56_v46, %v56_v46  ;;  %v2572_v51 = vld [vmem:[#allocation2 + $0x10c] ss:$12 sps:$4 sm:$0xff]   ;;  %v2894_v52 = vpack.c.bf16 %v58_v50, %v58_v50  ;;  %v2576_v54 = vld [vmem:[#allocation2 + $0x108] ss:$12 sps:$4 sm:$0xff]   ;;  %v2582_v58 = vld [vmem:[#allocation2 + $0xf0] ss:$12 sps:$4 sm:$0xff]  }
  0x2e   :  { %1377 = vmatpush1.bf16.msra.mxu0 %v2528_v18  ;;  %v2574_v53 = vld [vmem:[#allocation2 + $0x28c] ss:$12 sps:$4 sm:$0xff]   ;;  %v2577_v55 = vld [vmem:[#allocation2 + $0x288] ss:$12 sps:$4 sm:$0xff]   ;;  %v2583_v59 = vld [vmem:[#allocation2 + $0x270] ss:$12 sps:$4 sm:$0xff]  }
  0x2f   :  { %1418 = vmatpush1.bf16.msra.mxu1 %v2529_v19  ;;  %1378 = vmatprep.subr.bf16.mxu0 %v2530_v20  ;;  %v2578_v56 = vld [vmem:[#allocation2 + $0xf4] ss:$12 sps:$4 sm:$0xff]   ;;  %v2584_v60 = vld [vmem:[#allocation2 + $0xdc] ss:$12 sps:$4 sm:$0xff]   ;;  %v2588_v62 = vld [vmem:[#allocation2 + $0xd8] ss:$12 sps:$4 sm:$0xff]  }
  0x30   :  { %1419 = vmatprep.subr.bf16.mxu1 %v2532_v21  ;;  %1400 = vmatprep.mubr.bf16.mxu0 %v2889_v49  ;;  %v2580_v57 = vld [vmem:[#allocation2 + $0x274] ss:$12 sps:$4 sm:$0xff]   ;;  %v2586_v61 = vld [vmem:[#allocation2 + $0x25c] ss:$12 sps:$4 sm:$0xff]   ;;  %v2589_v63 = vld [vmem:[#allocation2 + $0x258] ss:$12 sps:$4 sm:$0xff]  }
  0x31   :  { %1441 = vmatprep.mubr.bf16.mxu1 %v2894_v52  ;;  %v2590_v0 = vld [vmem:[#allocation2 + $0xc4] ss:$12 sps:$4 sm:$0xff]   ;;  %v2594_v2 = vld [vmem:[#allocation2 + $0xc0] ss:$12 sps:$4 sm:$0xff]   ;;  %v2596_v10 = vld [vmem:[#allocation2 + $0x3a8] ss:$12 sps:$4 sm:$0xff]  }
  0x32   :  { %1379 = vmatpush1.bf16.msra.mxu0 %v2534_v22  ;;  %v2592_v1 = vld [vmem:[#allocation2 + $0x244] ss:$12 sps:$4 sm:$0xff]   ;;  %v2595_v3 = vld [vmem:[#allocation2 + $0x240] ss:$12 sps:$4 sm:$0xff]   ;;  %v2599_v11 = vld [vmem:[#allocation2 + $0x528] ss:$12 sps:$4 sm:$0xff]  }
  0x33   :  { %1420 = vmatpush1.bf16.msra.mxu1 %v2535_v23  ;;  %1380 = vmatprep.subr.bf16.mxu0 %v2536_v24  ;;  %v55_v4 = vld [vmem:[%s3046_s0] sm:$0xff]  ;;  %v57_v5 = vld [vmem:[%s3046_s0 + $0x10] sm:$0xff]  ;;  %v2598_v6 = vld [vmem:[#allocation2 + $0x3ac] ss:$12 sps:$4 sm:$0xff]  }
  0x34   :  { %1421 = vmatprep.subr.bf16.mxu1 %v2538_v25  ;;  %v2601_v7 = vld [vmem:[#allocation2 + $0x52c] ss:$12 sps:$4 sm:$0xff]   ;;  %v2904_v8 = vpack.c.bf16 %v55_v4, %v55_v4  ;;  %v2906_v9 = vpack.c.bf16 %v57_v5, %v57_v5  ;;  %v2604_v12 = vld [vmem:[#allocation2 + $0x394] ss:$12 sps:$4 sm:$0xff]   ;;  %v2602_v14 = vld [vmem:[#allocation2 + $0x390] ss:$12 sps:$4 sm:$0xff]  }
  0x35   :  { %v2607_v13 = vld [vmem:[#allocation2 + $0x514] ss:$12 sps:$4 sm:$0xff]   ;;  %v2605_v15 = vld [vmem:[#allocation2 + $0x510] ss:$12 sps:$4 sm:$0xff]   ;;  %v2608_v18 = vld [vmem:[#allocation2 + $0x378] ss:$12 sps:$4 sm:$0xff]  }
  0x36   :  { %1381 = vmatpush1.bf16.msra.mxu0 %v2540_v26  ;;  %v2610_v16 = vld [vmem:[#allocation2 + $0x37c] ss:$12 sps:$4 sm:$0xff]   ;;  %v2611_v19 = vld [vmem:[#allocation2 + $0x4f8] ss:$12 sps:$4 sm:$0xff]   ;;  %v2614_v22 = vld [vmem:[#allocation2 + $0x360] ss:$12 sps:$4 sm:$0xff]  }
  0x37   :  { %1422 = vmatpush1.bf16.msra.mxu1 %v2541_v27  ;;  %1382 = vmatprep.subr.bf16.mxu0 %v2542_v28  ;;  %v2613_v17 = vld [vmem:[#allocation2 + $0x4fc] ss:$12 sps:$4 sm:$0xff]   ;;  %v2616_v20 = vld [vmem:[#allocation2 + $0x364] ss:$12 sps:$4 sm:$0xff]   ;;  %v2617_v23 = vld [vmem:[#allocation2 + $0x4e0] ss:$12 sps:$4 sm:$0xff]  }
  0x38   :  { %1423 = vmatprep.subr.bf16.mxu1 %v2544_v29  ;;  %v2619_v21 = vld [vmem:[#allocation2 + $0x4e4] ss:$12 sps:$4 sm:$0xff]   ;;  %v2622_v24 = vld [vmem:[#allocation2 + $0x34c] ss:$12 sps:$4 sm:$0xff]   ;;  %v2620_v26 = vld [vmem:[#allocation2 + $0x348] ss:$12 sps:$4 sm:$0xff]  }
  0x39   :  { %v2625_v25 = vld [vmem:[#allocation2 + $0x4cc] ss:$12 sps:$4 sm:$0xff]   ;;  %v2623_v27 = vld [vmem:[#allocation2 + $0x4c8] ss:$12 sps:$4 sm:$0xff]   ;;  %v2674_v4 = vld [vmem:[#allocation2 + $0x3f0] ss:$12 sps:$4 sm:$0xff]  }
  0x3a   :  { %1383 = vmatpush1.bf16.msra.mxu0 %v2546_v30  ;;  %v2628_v28 = vld [vmem:[#allocation2 + $0x334] ss:$12 sps:$4 sm:$0xff]   ;;  %v2626_v30 = vld [vmem:[#allocation2 + $0x330] ss:$12 sps:$4 sm:$0xff]  }
  0x3b   :  { %1424 = vmatpush1.bf16.msra.mxu1 %v2547_v31  ;;  %1384 = vmatprep.subr.bf16.mxu0 %v2548_v32  ;;  %v2631_v29 = vld [vmem:[#allocation2 + $0x4b4] ss:$12 sps:$4 sm:$0xff]   ;;  %v2629_v31 = vld [vmem:[#allocation2 + $0x4b0] ss:$12 sps:$4 sm:$0xff]  }
  0x3c   :  { %1425 = vmatprep.subr.bf16.mxu1 %v2550_v33  ;;  %v2634_v32 = vld [vmem:[#allocation2 + $0x31c] ss:$12 sps:$4 sm:$0xff]   ;;  %v2655_v50 = vld [vmem:[#allocation2 + $0x5d4] ss:$12 sps:$4 sm:$0xff]  }
  0x3d   :  { %v2637_v33 = vld [vmem:[#allocation2 + $0x49c] ss:$12 sps:$4 sm:$0xff]  }
  0x3e   :  { %1385 = vmatpush2.bf16.msra.mxu0 %v2552_v34  ;;  %v60_v34 = vld [vmem:[%s3046_s0 + $0x28] sm:$0xff]  ;;  %v2677_v5 = vld [vmem:[#allocation2 + $0x570] ss:$12 sps:$4 sm:$0xff]  }
  0x3f   :  { %1426 = vmatpush2.bf16.msra.mxu1 %v2553_v35  ;;  %1386 = vmatprep.subr.bf16.mxu0 %v2554_v36  ;;  %v2632_v35 = vld [vmem:[#allocation2 + $0x318] ss:$12 sps:$4 sm:$0xff]   ;;  %v2644_v46 = vld [vmem:[#allocation2 + $0x468] ss:$12 sps:$4 sm:$0xff]  }
  0x40   :  { %1427 = vmatprep.subr.bf16.mxu1 %v2556_v37  ;;  %v2635_v36 = vld [vmem:[#allocation2 + $0x498] ss:$12 sps:$4 sm:$0xff]   ;;  %v2913_v37 = vpack.c.bf16 %v60_v34, %v60_v34  ;;  %v2706_v34 = vld [vmem:[#allocation2 + $0x68] ss:$12 sps:$4 sm:$0xff]  }
  0x42   :  { %1387 = vmatpush2.bf16.msra.mxu0 %v2558_v38  ;;  %v62_v38 = vld [vmem:[%s3046_s0 + $0x38] sm:$0xff] }
  0x43   :  { %1428 = vmatpush2.bf16.msra.mxu1 %v2559_v39  ;;  %1388 = vmatprep.subr.bf16.mxu0 %v2560_v40  ;;  %v2640_v39 = vld [vmem:[#allocation2 + $0x304] ss:$12 sps:$4 sm:$0xff]   ;;  %v2918_v40 = vpack.c.bf16 %v62_v38, %v62_v38 }
  0x44   :  { %1429 = vmatprep.subr.bf16.mxu1 %v2562_v41  ;;  %v2643_v41 = vld [vmem:[#allocation2 + $0x484] ss:$12 sps:$4 sm:$0xff]  }
  0x45   :  { %v2709_v38 = vld [vmem:[#allocation2 + $0x290] ss:$12 sps:$4 sm:$0xff]  }
  0x46   :  { %1389 = vmatpush2.bf16.msra.mxu0 %v2564_v42  ;;  %v2638_v42 = vld [vmem:[#allocation2 + $0x300] ss:$12 sps:$4 sm:$0xff]  }
  0x47   :  { %1430 = vmatpush2.bf16.msra.mxu1 %v2565_v43  ;;  %1390 = vmatprep.subr.bf16.mxu0 %v2566_v44  ;;  %v2641_v43 = vld [vmem:[#allocation2 + $0x480] ss:$12 sps:$4 sm:$0xff]  }
  0x48   :  { %1431 = vmatprep.subr.bf16.mxu1 %v2568_v45  ;;  %v2646_v44 = vld [vmem:[#allocation2 + $0x46c] ss:$12 sps:$4 sm:$0xff]  }
  0x49   :  { %v2649_v45 = vld [vmem:[#allocation2 + $0x5ec] ss:$12 sps:$4 sm:$0xff]  }
  0x4a   :  { %1391 = vmatpush2.bf16.msra.mxu0 %v2570_v47  ;;  %v2647_v47 = vld [vmem:[#allocation2 + $0x5e8] ss:$12 sps:$4 sm:$0xff]  }
  0x4b   :  { %1432 = vmatpush2.bf16.msra.mxu1 %v2571_v48  ;;  %1392 = vmatprep.subr.bf16.mxu0 %v2572_v51  ;;  %v2652_v48 = vld [vmem:[#allocation2 + $0x454] ss:$12 sps:$4 sm:$0xff]   ;;  %v2650_v51 = vld [vmem:[#allocation2 + $0x450] ss:$12 sps:$4 sm:$0xff]  }
  0x4c   :  { %1433 = vmatprep.subr.bf16.mxu1 %v2574_v53  ;;  %v2653_v53 = vld [vmem:[#allocation2 + $0x5d0] ss:$12 sps:$4 sm:$0xff]  }
  0x4e   :  { %1393 = vmatpush2.bf16.msra.mxu0 %v2576_v54  ;;  %v2658_v54 = vld [vmem:[#allocation2 + $0x43c] ss:$12 sps:$4 sm:$0xff]  }
  0x4f   :  { %1434 = vmatpush2.bf16.msra.mxu1 %v2577_v55  ;;  %1394 = vmatprep.subr.bf16.mxu0 %v2578_v56  ;;  %v2661_v55 = vld [vmem:[#allocation2 + $0x5bc] ss:$12 sps:$4 sm:$0xff]   ;;  %v2656_v56 = vld [vmem:[#allocation2 + $0x438] ss:$12 sps:$4 sm:$0xff]  }
  0x50   :  { %1435 = vmatprep.subr.bf16.mxu1 %v2580_v57  ;;  %v2659_v57 = vld [vmem:[#allocation2 + $0x5b8] ss:$12 sps:$4 sm:$0xff]  }
  0x52   :  { %1395 = vmatpush2.bf16.msra.mxu0 %v2582_v58  ;;  %v2664_v58 = vld [vmem:[#allocation2 + $0x424] ss:$12 sps:$4 sm:$0xff]  }
  0x53   :  { %1436 = vmatpush2.bf16.msra.mxu1 %v2583_v59  ;;  %1396 = vmatprep.subr.bf16.mxu0 %v2584_v60  ;;  %v2667_v59 = vld [vmem:[#allocation2 + $0x5a4] ss:$12 sps:$4 sm:$0xff]   ;;  %v2662_v60 = vld [vmem:[#allocation2 + $0x420] ss:$12 sps:$4 sm:$0xff]  }
  0x54   :  { %1437 = vmatprep.subr.bf16.mxu1 %v2586_v61  ;;  %v2665_v61 = vld [vmem:[#allocation2 + $0x5a0] ss:$12 sps:$4 sm:$0xff]  }
  0x56   :  { %1397 = vmatpush2.bf16.msra.mxu0 %v2588_v62  ;;  %v2670_v62 = vld [vmem:[#allocation2 + $0x40c] ss:$12 sps:$4 sm:$0xff]  }
  0x57   :  { %1438 = vmatpush2.bf16.msra.mxu1 %v2589_v63  ;;  %1398 = vmatprep.subr.bf16.mxu0 %v2590_v0  ;;  %v2673_v63 = vld [vmem:[#allocation2 + $0x58c] ss:$12 sps:$4 sm:$0xff]   ;;  %v2668_v0 = vld [vmem:[#allocation2 + $0x408] ss:$12 sps:$4 sm:$0xff]  }
  0x58   :  { %1439 = vmatprep.subr.bf16.mxu1 %v2592_v1  ;;  %v2671_v1 = vld [vmem:[#allocation2 + $0x588] ss:$12 sps:$4 sm:$0xff]  }
  0x5a   :  { %1399 = vmatpush2.bf16.msra.mxu0 %v2594_v2  ;;  %v2676_v2 = vld [vmem:[#allocation2 + $0x3f4] ss:$12 sps:$4 sm:$0xff]  }
  0x5b   :  { %1440 = vmatpush2.bf16.msra.mxu1 %v2595_v3  ;;  %1450 = vmatprep.subr.bf16.mxu0 %v2598_v6  ;;  %v2679_v3 = vld [vmem:[#allocation2 + $0x574] ss:$12 sps:$4 sm:$0xff]   ;;  %v2682_v6 = vld [vmem:[#allocation2 + $0x3dc] ss:$12 sps:$4 sm:$0xff]  }
  0x5c   :  { %1491 = vmatprep.subr.bf16.mxu1 %v2601_v7  ;;  %v2685_v7 = vld [vmem:[#allocation2 + $0x55c] ss:$12 sps:$4 sm:$0xff]  }
  0x5d   :  { %1401 = vmatmul.mubr.bf16.vlgmr.msra.gmra.mxu0 %v2904_v8 }
  0x5e   :  { %1442 = vmatmul.mubr.bf16.vlgmr.msra.gmra.mxu1 %v2906_v9  ;;  %1451 = vmatpush1.bf16.msra.mxu0 %v2596_v10  ;;  %v2680_v10 = vld [vmem:[#allocation2 + $0x3d8] ss:$12 sps:$4 sm:$0xff]  }
  0x5f   :  { %1492 = vmatpush1.bf16.msra.mxu1 %v2599_v11  ;;  %1452 = vmatprep.subr.bf16.mxu0 %v2604_v12  ;;  %v2683_v11 = vld [vmem:[#allocation2 + $0x558] ss:$12 sps:$4 sm:$0xff]  }
  0x60   :  { %1493 = vmatprep.subr.bf16.mxu1 %v2607_v13  ;;  %1482 = vmatprep.mubr.bf16.mxu0 %v2913_v37  ;;  %v2688_v12 = vld [vmem:[#allocation2 + $0x3c4] ss:$12 sps:$4 sm:$0xff]  }
  0x61   :  { %1523 = vmatprep.mubr.bf16.mxu1 %v2918_v40  ;;  %v2691_v13 = vld [vmem:[#allocation2 + $0x544] ss:$12 sps:$4 sm:$0xff]  }
  0x62   :  { %1453 = vmatpush1.bf16.msra.mxu0 %v2602_v14  ;;  %v2686_v14 = vld [vmem:[#allocation2 + $0x3c0] ss:$12 sps:$4 sm:$0xff]  }
  0x63   :  { %1494 = vmatpush1.bf16.msra.mxu1 %v2605_v15  ;;  %1454 = vmatprep.subr.bf16.mxu0 %v2610_v16  ;;  %v2689_v15 = vld [vmem:[#allocation2 + $0x540] ss:$12 sps:$4 sm:$0xff]  }
  0x64   :  { %1495 = vmatprep.subr.bf16.mxu1 %v2613_v17  ;;  %v59_v16 = vld [vmem:[%s3046_s0 + $0x20] sm:$0xff]  ;;  %v61_v17 = vld [vmem:[%s3046_s0 + $0x30] sm:$0xff] }
  0x66   :  { %1455 = vmatpush1.bf16.msra.mxu0 %v2608_v18  ;;  %v2692_v18 = vld [vmem:[#allocation2 + $0x170] ss:$12 sps:$4 sm:$0xff]  }
  0x67   :  { %1496 = vmatpush1.bf16.msra.mxu1 %v2611_v19  ;;  %1456 = vmatprep.subr.bf16.mxu0 %v2616_v20  ;;  %v2693_v19 = vld [vmem:[#allocation2 + $0x2f0] ss:$12 sps:$4 sm:$0xff]  }
  0x68   :  { %1497 = vmatprep.subr.bf16.mxu1 %v2619_v21  ;;  %v2694_v20 = vld [vmem:[#allocation2 + $0xb0] ss:$12 sps:$4 sm:$0xff]   ;;  %v2928_v21 = vpack.c.bf16 %v59_v16, %v59_v16  ;;  %v2752_v16 = vld [vmem:[#allocation2 + $0x3c8] ss:$12 sps:$4 sm:$0xff]  }
  0x6a   :  { %1457 = vmatpush1.bf16.msra.mxu0 %v2614_v22  ;;  %v2930_v22 = vpack.c.bf16 %v61_v17, %v61_v17  ;;  %v2753_v17 = vld [vmem:[#allocation2 + $0x548] ss:$12 sps:$4 sm:$0xff]  }
  0x6b   :  { %1498 = vmatpush1.bf16.msra.mxu1 %v2617_v23  ;;  %1458 = vmatprep.subr.bf16.mxu0 %v2622_v24  ;;  %v2695_v23 = vld [vmem:[#allocation2 + $0x230] ss:$12 sps:$4 sm:$0xff]   ;;  %v2696_v24 = vld [vmem:[#allocation2 + $0x158] ss:$12 sps:$4 sm:$0xff]  }
  0x6c   :  { %1499 = vmatprep.subr.bf16.mxu1 %v2625_v25  ;;  %v2697_v25 = vld [vmem:[#allocation2 + $0x2d8] ss:$12 sps:$4 sm:$0xff]  }
  0x6e   :  { %1459 = vmatpush1.bf16.msra.mxu0 %v2620_v26  ;;  %v2698_v26 = vld [vmem:[#allocation2 + $0x98] ss:$12 sps:$4 sm:$0xff]  }
  0x6f   :  { %1500 = vmatpush1.bf16.msra.mxu1 %v2623_v27  ;;  %1460 = vmatprep.subr.bf16.mxu0 %v2628_v28  ;;  %v2699_v27 = vld [vmem:[#allocation2 + $0x218] ss:$12 sps:$4 sm:$0xff]   ;;  %v2700_v28 = vld [vmem:[#allocation2 + $0x140] ss:$12 sps:$4 sm:$0xff]  }
  0x70   :  { %1501 = vmatprep.subr.bf16.mxu1 %v2631_v29  ;;  %v2701_v29 = vld [vmem:[#allocation2 + $0x2c0] ss:$12 sps:$4 sm:$0xff]  }
  0x72   :  { %1461 = vmatpush1.bf16.msra.mxu0 %v2626_v30  ;;  %v2702_v30 = vld [vmem:[#allocation2 + $0x80] ss:$12 sps:$4 sm:$0xff]  }
  0x73   :  { %1502 = vmatpush1.bf16.msra.mxu1 %v2629_v31  ;;  %1462 = vmatprep.subr.bf16.mxu0 %v2634_v32  ;;  %v2703_v31 = vld [vmem:[#allocation2 + $0x200] ss:$12 sps:$4 sm:$0xff]   ;;  %v2704_v32 = vld [vmem:[#allocation2 + $0x128] ss:$12 sps:$4 sm:$0xff]  }
  0x74   :  { %1503 = vmatprep.subr.bf16.mxu1 %v2637_v33  ;;  %v2705_v33 = vld [vmem:[#allocation2 + $0x2a8] ss:$12 sps:$4 sm:$0xff]  }
  0x76   :  { %1463 = vmatpush1.bf16.msra.mxu0 %v2632_v35  ;;  %v2707_v35 = vld [vmem:[#allocation2 + $0x1e8] ss:$12 sps:$4 sm:$0xff]  }
  0x77   :  { %1504 = vmatpush1.bf16.msra.mxu1 %v2635_v36  ;;  %1464 = vmatprep.subr.bf16.mxu0 %v2640_v39  ;;  %v2708_v36 = vld [vmem:[#allocation2 + $0x110] ss:$12 sps:$4 sm:$0xff]  }
  0x78   :  { %1505 = vmatprep.subr.bf16.mxu1 %v2643_v41  ;;  %v2710_v39 = vld [vmem:[#allocation2 + $0x50] ss:$12 sps:$4 sm:$0xff]  }
  0x79   :  { %v2711_v41 = vld [vmem:[#allocation2 + $0x1d0] ss:$12 sps:$4 sm:$0xff]  }
  0x7a   :  { %1465 = vmatpush1.bf16.msra.mxu0 %v2638_v42  ;;  %v2714_v42 = vld [vmem:[#allocation2 + $0x38] ss:$12 sps:$4 sm:$0xff]  }
  0x7b   :  { %1506 = vmatpush1.bf16.msra.mxu1 %v2641_v43  ;;  %1466 = vmatprep.subr.bf16.mxu0 %v2646_v44  ;;  %v2715_v43 = vld [vmem:[#allocation2 + $0x1b8] ss:$12 sps:$4 sm:$0xff]   ;;  %v2716_v44 = vld [vmem:[#allocation2 + $0xe0] ss:$12 sps:$4 sm:$0xff]  }
  0x7c   :  { %1507 = vmatprep.subr.bf16.mxu1 %v2649_v45  ;;  %v2717_v45 = vld [vmem:[#allocation2 + $0x260] ss:$12 sps:$4 sm:$0xff]  }
  0x7e   :  { %1467 = vmatpush2.bf16.msra.mxu0 %v2644_v46  ;;  %v2718_v46 = vld [vmem:[#allocation2 + $0x20] ss:$12 sps:$4 sm:$0xff]  }
  0x7f   :  { %1508 = vmatpush2.bf16.msra.mxu1 %v2647_v47  ;;  %1468 = vmatprep.subr.bf16.mxu0 %v2652_v48  ;;  %v2719_v47 = vld [vmem:[#allocation2 + $0x1a0] ss:$12 sps:$4 sm:$0xff]   ;;  %v2720_v48 = vld [vmem:[#allocation2 + $0xc8] ss:$12 sps:$4 sm:$0xff]  }
  0x80   :  { %1509 = vmatprep.subr.bf16.mxu1 %v2655_v50  ;;  %v2721_v50 = vld [vmem:[#allocation2 + $0x248] ss:$12 sps:$4 sm:$0xff]  }
  0x82   :  { %1469 = vmatpush2.bf16.msra.mxu0 %v2650_v51  ;;  %v2722_v51 = vld [vmem:[#allocation2 + $0x8] ss:$12 sps:$4 sm:$0xff]  }
  0x83   :  { %1510 = vmatpush2.bf16.msra.mxu1 %v2653_v53  ;;  %1470 = vmatprep.subr.bf16.mxu0 %v2658_v54  ;;  %v2723_v53 = vld [vmem:[#allocation2 + $0x188] ss:$12 sps:$4 sm:$0xff]   ;;  %v2724_v54 = vld [vmem:[#allocation2 + $0x470] ss:$12 sps:$4 sm:$0xff]  }
  0x84   :  { %1511 = vmatprep.subr.bf16.mxu1 %v2661_v55  ;;  %v2725_v55 = vld [vmem:[#allocation2 + $0x5f0] ss:$12 sps:$4 sm:$0xff]  }
  0x86   :  { %1471 = vmatpush2.bf16.msra.mxu0 %v2656_v56  ;;  %v2726_v56 = vld [vmem:[#allocation2 + $0x3b0] ss:$12 sps:$4 sm:$0xff]  }
  0x87   :  { %1512 = vmatpush2.bf16.msra.mxu1 %v2659_v57  ;;  %1472 = vmatprep.subr.bf16.mxu0 %v2664_v58  ;;  %v2727_v57 = vld [vmem:[#allocation2 + $0x530] ss:$12 sps:$4 sm:$0xff]   ;;  %v2728_v58 = vld [vmem:[#allocation2 + $0x458] ss:$12 sps:$4 sm:$0xff]  }
  0x88   :  { %1513 = vmatprep.subr.bf16.mxu1 %v2667_v59  ;;  %v2729_v59 = vld [vmem:[#allocation2 + $0x5d8] ss:$12 sps:$4 sm:$0xff]  }
  0x8a   :  { %1473 = vmatpush2.bf16.msra.mxu0 %v2662_v60  ;;  %v2730_v60 = vld [vmem:[#allocation2 + $0x398] ss:$12 sps:$4 sm:$0xff]  }
  0x8b   :  { %1514 = vmatpush2.bf16.msra.mxu1 %v2665_v61  ;;  %1474 = vmatprep.subr.bf16.mxu0 %v2670_v62  ;;  %v2731_v61 = vld [vmem:[#allocation2 + $0x518] ss:$12 sps:$4 sm:$0xff]   ;;  %v2732_v62 = vld [vmem:[#allocation2 + $0x440] ss:$12 sps:$4 sm:$0xff]  }
  0x8c   :  { %1515 = vmatprep.subr.bf16.mxu1 %v2673_v63  ;;  %v2733_v63 = vld [vmem:[#allocation2 + $0x5c0] ss:$12 sps:$4 sm:$0xff]  }
  0x8e   :  { %1475 = vmatpush2.bf16.msra.mxu0 %v2668_v0  ;;  %v2734_v0 = vld [vmem:[#allocation2 + $0x380] ss:$12 sps:$4 sm:$0xff]  }
  0x8f   :  { %1516 = vmatpush2.bf16.msra.mxu1 %v2671_v1  ;;  %1476 = vmatprep.subr.bf16.mxu0 %v2676_v2  ;;  %v2735_v1 = vld [vmem:[#allocation2 + $0x500] ss:$12 sps:$4 sm:$0xff]   ;;  %v2736_v2 = vld [vmem:[#allocation2 + $0x428] ss:$12 sps:$4 sm:$0xff]  }
  0x90   :  { %1517 = vmatprep.subr.bf16.mxu1 %v2679_v3  ;;  %v2737_v3 = vld [vmem:[#allocation2 + $0x5a8] ss:$12 sps:$4 sm:$0xff]  }
  0x92   :  { %1477 = vmatpush2.bf16.msra.mxu0 %v2674_v4  ;;  %v2740_v4 = vld [vmem:[#allocation2 + $0x410] ss:$12 sps:$4 sm:$0xff]  }
  0x93   :  { %1518 = vmatpush2.bf16.msra.mxu1 %v2677_v5  ;;  %1478 = vmatprep.subr.bf16.mxu0 %v2682_v6  ;;  %v2741_v5 = vld [vmem:[#allocation2 + $0x590] ss:$12 sps:$4 sm:$0xff]  }
  0x94   :  { %1519 = vmatprep.subr.bf16.mxu1 %v2685_v7  ;;  %v2742_v6 = vld [vmem:[#allocation2 + $0x350] ss:$12 sps:$4 sm:$0xff]  }
  0x95   :  { %v2743_v7 = vld [vmem:[#allocation2 + $0x4d0] ss:$12 sps:$4 sm:$0xff]  }
  0x96   :  { %1479 = vmatpush2.bf16.msra.mxu0 %v2680_v10  ;;  %v2746_v10 = vld [vmem:[#allocation2 + $0x338] ss:$12 sps:$4 sm:$0xff]  }
  0x97   :  { %1520 = vmatpush2.bf16.msra.mxu1 %v2683_v11  ;;  %1480 = vmatprep.subr.bf16.mxu0 %v2688_v12  ;;  %v2747_v11 = vld [vmem:[#allocation2 + $0x4b8] ss:$12 sps:$4 sm:$0xff]   ;;  %v2748_v12 = vld [vmem:[#allocation2 + $0x3e0] ss:$12 sps:$4 sm:$0xff]  }
  0x98   :  { %1521 = vmatprep.subr.bf16.mxu1 %v2691_v13  ;;  %v2749_v13 = vld [vmem:[#allocation2 + $0x560] ss:$12 sps:$4 sm:$0xff]  }
  0x9a   :  { %1481 = vmatpush2.bf16.msra.mxu0 %v2686_v14  ;;  %v2750_v14 = vld [vmem:[#allocation2 + $0x320] ss:$12 sps:$4 sm:$0xff]  }
  0x9b   :  { %1522 = vmatpush2.bf16.msra.mxu1 %v2689_v15  ;;  %2324 = vmatprep.subr.bf16.mxu0 %v2692_v18  ;;  %v2751_v15 = vld [vmem:[#allocation2 + $0x4a0] ss:$12 sps:$4 sm:$0xff]   ;;  %v2754_v18 = vld [vmem:[#allocation2 + $0x308] ss:$12 sps:$4 sm:$0xff]  }
  0x9c   :  { %2346 = vmatprep.subr.bf16.mxu1 %v2693_v19  ;;  %v2755_v19 = vld [vmem:[#allocation2 + $0x488] ss:$12 sps:$4 sm:$0xff]  }
  0x9d   :  { %1483 = vmatmul.mubr.bf16.vlgmr.msra.gmra.mxu0 %v2928_v21 }
  0x9e   :  { %1524 = vmatmul.mubr.bf16.vlgmr.msra.gmra.mxu1 %v2930_v22  ;;  %2325 = vmatpush3.bf16.msra.mxu0 %v2694_v20  ;;  %v2756_v20 = vld [vmem:[%s3049_s3 + $0x78] sm:$0xff]  }
  0x9f   :  { %2347 = vmatpush3.bf16.msra.mxu1 %v2695_v23  ;;  %2326 = vmatprep.subr.bf16.mxu0 %v2696_v24  ;;  %v2757_v23 = vld [vmem:[%s3049_s3 + $0x38] sm:$0xff]   ;;  %v2758_v24 = vld [vmem:[%s3049_s3 + $0x70] sm:$0xff]  }
  0xa0   :  { %2348 = vmatprep.subr.bf16.mxu1 %v2697_v25  ;;  %1564 = vmatprep.mubr.bf16.mxu0 %v2889_v49  ;;  %v2712_v49 = vld [vmem:[#allocation2 + $0xf8] ss:$12 sps:$4 sm:$0xff]   ;;  %v2759_v25 = vld [vmem:[%s3049_s3 + $0x30] sm:$0xff]  }
  0xa1   :  { %1604 = vmatprep.mubr.bf16.mxu1 %v2894_v52  ;;  %v2713_v52 = vld [vmem:[#allocation2 + $0x278] ss:$12 sps:$4 sm:$0xff]  }
  0xa2   :  { %2327 = vmatpush3.bf16.msra.mxu0 %v2698_v26  ;;  %v2760_v26 = vld [vmem:[%s3049_s3 + $0x68] sm:$0xff]  }
  0xa3   :  { %2349 = vmatpush3.bf16.msra.mxu1 %v2699_v27  ;;  %2328 = vmatprep.subr.bf16.mxu0 %v2700_v28  ;;  %v2761_v27 = vld [vmem:[%s3049_s3 + $0x28] sm:$0xff]   ;;  %v2764_v28 = vld [vmem:[%s3049_s3 + $0x58] sm:$0xff]  }
  0xa4   :  { %2350 = vmatprep.subr.bf16.mxu1 %v2701_v29  ;;  %v2765_v29 = vld [vmem:[%s3049_s3 + $0x18] sm:$0xff]  }
  0xa6   :  { %2329 = vmatpush3.bf16.msra.mxu0 %v2702_v30  ;;  %v2766_v30 = vld [vmem:[%s3049_s3 + $0x50] sm:$0xff]  }
  0xa7   :  { %2351 = vmatpush3.bf16.msra.mxu1 %v2703_v31  ;;  %2330 = vmatprep.subr.bf16.mxu0 %v2704_v32  ;;  %v2767_v31 = vld [vmem:[%s3049_s3 + $0x10] sm:$0xff]   ;;  %v2768_v32 = vld [vmem:[%s3049_s3 + $0x48] sm:$0xff]  }
  0xa8   :  { %2352 = vmatprep.subr.bf16.mxu1 %v2705_v33  ;;  %v2769_v33 = vld [vmem:[%s3049_s3 + $0x8] sm:$0xff]  }
  0xaa   :  { %2331 = vmatpush3.bf16.msra.mxu0 %v2706_v34  ;;  %v2770_v34 = vld [vmem:[%s3049_s3 + $0x40] sm:$0xff]  }
  0xab   :  { %2353 = vmatpush3.bf16.msra.mxu1 %v2707_v35  ;;  %2332 = vmatprep.subr.bf16.mxu0 %v2708_v36  ;;  %v2771_v35 = vld [vmem:[%s3049_s3] sm:$0xff]   ;;  %v2772_v36 = vld [vmem:[%s3049_s3 + $0xb8] sm:$0xff]  }
  0xac   :  { %2354 = vmatprep.subr.bf16.mxu1 %v2709_v38  ;;  %v2838_v38 = vmov 0.0  }
  0xae   :  { %2333 = vmatpush3.bf16.msra.mxu0 %v2710_v39  ;;  %v2773_v39 = vld [vmem:[%s3049_s3 + $0xb0] sm:$0xff]  }
  0xaf   :  { %2355 = vmatpush3.bf16.msra.mxu1 %v2711_v41  ;;  %2334 = vmatprep.subr.bf16.mxu0 %v2712_v49  ;;  %v2774_v41 = vld [vmem:[%s3049_s3 + $0xa8] sm:$0xff]   ;;  %v2775_v49 = vld [vmem:[%s3049_s3 + $0xa0] sm:$0xff]  }
  0xb0   :  { %2356 = vmatprep.subr.bf16.mxu1 %v2713_v52  ;;  %v2776_v52 = vld [vmem:[%s3049_s3 + $0x98] sm:$0xff]  }
  0xb2   :  { %2335 = vmatpush3.bf16.msra.mxu0 %v2714_v42 }
  0xb3   :  { %2357 = vmatpush3.bf16.msra.mxu1 %v2715_v43  ;;  %2336 = vmatprep.subr.bf16.mxu0 %v2716_v44  ;;  %v2777_v44 = vld [vmem:[%s3049_s3 + $0x90] sm:$0xff]  }
  0xb4   :  { %2358 = vmatprep.subr.bf16.mxu1 %v2717_v45 }
  0xb6   :  { %2337 = vmatpush3.bf16.msra.mxu0 %v2718_v46 }
  0xb7   :  { %2359 = vmatpush3.bf16.msra.mxu1 %v2719_v47  ;;  %2338 = vmatprep.subr.bf16.mxu0 %v2720_v48 }
  0xb8   :  { %2360 = vmatprep.subr.bf16.mxu1 %v2721_v50  ;;  %v2778_v50 = vld [vmem:[%s3049_s3 + $0x88] sm:$0xff]  }
  0xba   :  { %2339 = vmatpush3.bf16.msra.mxu0 %v2722_v51 }
  0xbb   :  { %2361 = vmatpush3.bf16.msra.mxu1 %v2723_v53  ;;  %2368 = vmatprep.subr.bf16.mxu0 %v2724_v54  ;;  %v2779_v54 = vld [vmem:[%s3049_s3 + $0x80] sm:$0xff]  }
  0xbc   :  { %2390 = vmatprep.subr.bf16.mxu1 %v2725_v55  ;;  %v329_v55 = vlaneseq }
  0xbd   :  { %1565 = vmatmul.mubr.bf16.vlgmr.msra.gmra.mxu0 %v2904_v8  ;;  %v2738_v8 = vld [vmem:[#allocation2 + $0x368] ss:$12 sps:$4 sm:$0xff]  }
  0xbe   :  { %1605 = vmatmul.mubr.bf16.vlgmr.msra.gmra.mxu1 %v2906_v9  ;;  %2369 = vmatpush3.bf16.msra.mxu0 %v2726_v56  ;;  %v2739_v9 = vld [vmem:[#allocation2 + $0x4e8] ss:$12 sps:$4 sm:$0xff]   ;;  %v330_v56 = vshrl.u32 %v329_v55, 7 }
  0xbf   :  { %2391 = vmatpush3.bf16.msra.mxu1 %v2727_v57  ;;  %2370 = vmatprep.subr.bf16.mxu0 %v2728_v58  ;;  %v319_v58 = vld [vmem:[%s3048_s2] sm:$0x7] }
  0xc0   :  { %2392 = vmatprep.subr.bf16.mxu1 %v2729_v59  ;;  %1644 = vmatprep.mubr.bf16.mxu0 %v2913_v37  ;;  %v2744_v37 = vld [vmem:[#allocation2 + $0x3f8] ss:$12 sps:$4 sm:$0xff]   ;;  %v331_v57 = vsub.s32 0, %v330_v56  ;;  %v335_v59 = vsub.s32 1, %v330_v56 }
  0xc1   :  { %1684 = vmatprep.mubr.bf16.mxu1 %v2918_v40  ;;  %v2745_v40 = vld [vmem:[#allocation2 + $0x578] ss:$12 sps:$4 sm:$0xff]  }
  0xc2   :  { %2371 = vmatpush3.bf16.msra.mxu0 %v2730_v60  ;;  %v332_v60 = vrot.slane %v319_v58, %v331_v57 }
  0xc3   :  { %2393 = vmatpush3.bf16.msra.mxu1 %v2731_v61  ;;  %2372 = vmatprep.subr.bf16.mxu0 %v2732_v62  ;;  %v336_v61 = vrot.slane %v319_v58, %v335_v59 }
  0xc4   :  { %2394 = vmatprep.subr.bf16.mxu1 %v2733_v63 }
  0xc6   :  { %2373 = vmatpush3.bf16.msra.mxu0 %v2734_v0 }
  0xc7   :  { %2395 = vmatpush3.bf16.msra.mxu1 %v2735_v1  ;;  %2374 = vmatprep.subr.bf16.mxu0 %v2736_v2 }
  0xc8   :  { %2396 = vmatprep.subr.bf16.mxu1 %v2737_v3 }
  0xca   :  { %2375 = vmatpush3.bf16.msra.mxu0 %v2738_v8 }
  0xcb   :  { %2397 = vmatpush3.bf16.msra.mxu1 %v2739_v9  ;;  %2376 = vmatprep.subr.bf16.mxu0 %v2740_v4 }
  0xcc   :  { %2398 = vmatprep.subr.bf16.mxu1 %v2741_v5 }
  0xce   :  { %2377 = vmatpush3.bf16.msra.mxu0 %v2742_v6 }
  0xcf   :  { %2399 = vmatpush3.bf16.msra.mxu1 %v2743_v7  ;;  %2378 = vmatprep.subr.bf16.mxu0 %v2744_v37 }
  0xd0   :  { %2400 = vmatprep.subr.bf16.mxu1 %v2745_v40 }
  0xd2   :  { %2379 = vmatpush3.bf16.msra.mxu0 %v2746_v10 }
  0xd3   :  { %2401 = vmatpush3.bf16.msra.mxu1 %v2747_v11  ;;  %2380 = vmatprep.subr.bf16.mxu0 %v2748_v12 }
  0xd4   :  { %2402 = vmatprep.subr.bf16.mxu1 %v2749_v13 }
  0xd6   :  { %2381 = vmatpush3.bf16.msra.mxu0 %v2750_v14 }
  0xd7   :  { %2403 = vmatpush3.bf16.msra.mxu1 %v2751_v15  ;;  %2382 = vmatprep.subr.bf16.mxu0 %v2752_v16 }
  0xd8   :  { %2404 = vmatprep.subr.bf16.mxu1 %v2753_v17 }
  0xda   :  { %2383 = vmatpush3.bf16.msra.mxu0 %v2754_v18 }
  0xdb   :  { %2405 = vmatpush3.bf16.msra.mxu1 %v2755_v19  ;;  %2412 = vmatprep.subr.bf16.mxu0 %v2756_v20 }
  0xdc   :  { %2452 = vmatprep.subr.bf16.mxu1 %v2838_v38 }
  0xdd   :  { %1645 = vmatmul.mubr.bf16.vlgmr.msra.gmra.mxu0 %v2928_v21  ;;  %v2762_v21 = vld [vmem:[%s3049_s3 + $0x60] sm:$0xff]  }
  0xde   :  { %1685 = vmatmul.mubr.bf16.vlgmr.msra.gmra.mxu1 %v2930_v22  ;;  %2413 = vmatpush3.bf16.msra.mxu0 %v2757_v23  ;;  %v2763_v22 = vld [vmem:[%s3049_s3 + $0x20] sm:$0xff]  }
  0xdf   :  { %2414 = vmatprep.subr.bf16.mxu0 %v2758_v24  ;;  %2453 = vmatpush3.bf16.msra.mxu1 %v2772_v36 }
  0xe0   :  { %2454 = vmatprep.subr.bf16.mxu1 %v2838_v38  ;;  %2468 = vmatprep.mubr.msk.bf16.mxu1 %vm2839_vm0, %v2838_v38 }
  0xe2   :  { %2415 = vmatpush3.bf16.msra.mxu0 %v2759_v25 }
  0xe3   :  { %2416 = vmatprep.subr.bf16.mxu0 %v2760_v26  ;;  %2455 = vmatpush3.bf16.msra.mxu1 %v2773_v39  ;;  %v339_v26 = vsub.s32 2, %v330_v56 }
  0xe4   :  { %2456 = vmatprep.subr.bf16.mxu1 %v2838_v38 }
  0xe6   :  { %2417 = vmatpush3.bf16.msra.mxu0 %v2761_v27  ;;  %v340_v27 = vrot.slane %v319_v58, %v339_v26 }
  0xe7   :  { %2418 = vmatprep.subr.bf16.mxu0 %v2762_v21  ;;  %2457 = vmatpush3.bf16.msra.mxu1 %v2774_v41 }
  0xe8   :  { %2458 = vmatprep.subr.bf16.mxu1 %v2838_v38 }
  0xea   :  { %2419 = vmatpush3.bf16.msra.mxu0 %v2763_v22 }
  0xeb   :  { %2420 = vmatprep.subr.bf16.mxu0 %v2764_v28  ;;  %2459 = vmatpush3.bf16.msra.mxu1 %v2775_v49 }
  0xec   :  { %2460 = vmatprep.subr.bf16.mxu1 %v2838_v38 }
  0xee   :  { %2421 = vmatpush3.bf16.msra.mxu0 %v2765_v29 }
  0xef   :  { %2422 = vmatprep.subr.bf16.mxu0 %v2766_v30  ;;  %2461 = vmatpush3.bf16.msra.mxu1 %v2776_v52 }
  0xf0   :  { %2462 = vmatprep.subr.bf16.mxu1 %v2838_v38 }
  0xf2   :  { %2423 = vmatpush3.bf16.msra.mxu0 %v2767_v31 }
  0xf3   :  { %2424 = vmatprep.subr.bf16.mxu0 %v2768_v32  ;;  %2463 = vmatpush3.bf16.msra.mxu1 %v2777_v44 }
  0xf4   :  { %2464 = vmatprep.subr.bf16.mxu1 %v2838_v38 }
  0xf6   :  { %2425 = vmatpush3.bf16.msra.mxu0 %v2769_v33 }
  0xf7   :  { %2426 = vmatprep.subr.bf16.mxu0 %v2770_v34  ;;  %2465 = vmatpush3.bf16.msra.mxu1 %v2778_v50  ;;  %v2784_v50 = vld [vmem:[#allocation4 + $0x18] sm:$0xff]  }
  0xf8   :  { %2466 = vmatprep.subr.bf16.mxu1 %v2838_v38 }
  0xfa   :  { %2427 = vmatpush3.bf16.msra.mxu0 %v2771_v35 }
  0xfb   :  { %2472 = vmatprep.subr.bf16.mxu0 %v2838_v38  ;;  %2467 = vmatpush3.bf16.msra.mxu1 %v2779_v54  ;;  %v2787_v54 = vld [vmem:[#allocation4] sm:$0xff]  }
 0x11d   :  { %v1402_v42 = vpop.f32.mrf.mxu0 }
 0x11e   :  { %v1443_v43 = vpop.f32.mrf.mxu1  ;;  %v1403_v62 = vadd.f32 %v1402_v42, %v332_v60  ;;  %v2290_v60 = vld [vmem:[%s3050_s4] ss:$0 sm:$0xff] }
 0x11f   :  { %v1404_v45 = vpop.f32.mrf.mxu0 }
 0x120   :  { %v1445_v46 = vpop.f32.mrf.mxu1  ;;  %v1405_v63 = vadd.f32 %v1404_v45, %v336_v61  ;;  %v1444_v0 = vadd.f32 %v1443_v43, %v1403_v62  ;;  %v2780_v45 = vld [vmem:[#allocation4 + $0x38] sm:$0xff]  }
 0x121   :  { %v1406_v47 = vpop.f32.mrf.mxu0 }
 0x122   :  { %v1447_v48 = vpop.f32.mrf.mxu1  ;;  %v1446_v3 = vadd.f32 %v1445_v46, %v1405_v63  ;;  %v2781_v46 = vld [vmem:[#allocation4 + $0x30] sm:$0xff]   ;;  %v2782_v47 = vld [vmem:[#allocation4 + $0x28] sm:$0xff]  }
 0x123   :  { %v1407_v51 = vpop.f32.mrf.mxu0  ;;  %v2783_v48 = vld [vmem:[#allocation4 + $0x20] sm:$0xff]  }
 0x124   :  { %v1448_v53 = vpop.f32.mrf.mxu1  ;;  %v2785_v51 = vld [vmem:[#allocation4 + $0x10] sm:$0xff]  }
 0x125   :  { %v2786_v53 = vld [vmem:[#allocation4 + $0x8] sm:$0xff]  }
 0x15d   :  { %v1484_v1 = vpop.f32.mrf.mxu0 }
 0x15e   :  { %v1525_v2 = vpop.f32.mrf.mxu1  ;;  %v1485_v8 = vadd.f32 %v1484_v1, %v1444_v0 }
 0x15f   :  { %v1486_v9 = vpop.f32.mrf.mxu0 }
 0x160   :  { %v1527_v4 = vpop.f32.mrf.mxu1  ;;  %v1526_v5 = vadd.f32 %v1525_v2, %v1485_v8  ;;  %v1487_v6 = vadd.f32 %v1486_v9, %v1446_v3 }
 0x161   :  { %v1488_v7 = vpop.f32.mrf.mxu0 }
 0x162   :  { %v1529_v37 = vpop.f32.mrf.mxu1  ;;  %v1528_v40 = vadd.f32 %v1527_v4, %v1487_v6  ;;  %v1692_v10 = vmax.f32 %v1526_v5, 0.0 }
 0x163   :  { %v1489_v11 = vpop.f32.mrf.mxu0 }
 0x164   :  { %v1530_v12 = vpop.f32.mrf.mxu1  ;;  %v1693_v13 = vmax.f32 %v1528_v40, 0.0  ;;  %v1744_v15 = vpack.c.bf16 %v1692_v10, %v1692_v10 }
 0x166   :  { %v1745_v14 = vpack.c.bf16 %v1693_v13, %v1693_v13 }
 0x168   :  { %1929 = vmatprep.mubr.bf16.mxu0 %v1745_v14 }
 0x169   :  { %1930 = vmatmul.mubr.bf16.vlgmr.msra.gmra.mxu0 %v1744_v15 }
 0x16a   :  { %2488 = vmatprep.mubr.msk.bf16.mxu0 %vm2839_vm0, %v2838_v38  ;;  %2473 = vmatpush3.bf16.msra.mxu0 %v2780_v45 }
 0x16b   :  { %2474 = vmatprep.subr.bf16.mxu0 %v2838_v38 }
 0x16e   :  { %2475 = vmatpush3.bf16.msra.mxu0 %v2781_v46 }
 0x16f   :  { %2476 = vmatprep.subr.bf16.mxu0 %v2838_v38 }
 0x172   :  { %2477 = vmatpush3.bf16.msra.mxu0 %v2782_v47 }
 0x173   :  { %2478 = vmatprep.subr.bf16.mxu0 %v2838_v38 }
 0x176   :  { %2479 = vmatpush3.bf16.msra.mxu0 %v2783_v48 }
 0x177   :  { %2480 = vmatprep.subr.bf16.mxu0 %v2838_v38 }
 0x17a   :  { %2481 = vmatpush3.bf16.msra.mxu0 %v2784_v50 }
 0x17b   :  { %2482 = vmatprep.subr.bf16.mxu0 %v2838_v38 }
 0x17d   :  { %v2340_v16 = vpop.f32.mrf.mxu0 }
 0x17e   :  { %v2362_v17 = vpop.f32.mrf.mxu1  ;;  %2483 = vmatpush3.bf16.msra.mxu0 %v2785_v51 }
 0x17f   :  { %v2341_v18 = vpop.f32.mrf.mxu0  ;;  %2484 = vmatprep.subr.bf16.mxu0 %v2838_v38 }
 0x180   :  { %v2363_v19 = vpop.f32.mrf.mxu1  ;;  %v2342_v21 = vadd.f32 %v2341_v18, %v2340_v16 }
 0x181   :  { %v2343_v20 = vpop.f32.mrf.mxu0  ;;  %v2364_v28 = vadd.f32 %v2363_v19, %v2362_v17 }
 0x182   :  { %v2365_v23 = vpop.f32.mrf.mxu1  ;;  %v1567_v22 = vadd.f32 %v2342_v21, %v340_v27  ;;  %2485 = vmatpush3.bf16.msra.mxu0 %v2786_v53 }
 0x183   :  { %v2344_v24 = vpop.f32.mrf.mxu0  ;;  %2486 = vmatprep.subr.bf16.mxu0 %v2838_v38  ;;  %v2315_v38 = vld [vmem:[%s3052_s6] ss:$0 sm:$0xff] }
 0x184   :  { %v2366_v25 = vpop.f32.mrf.mxu1  ;;  %v1607_v33 = vadd.f32 %v2364_v28, %v1567_v22 }
 0x186   :  { %2487 = vmatpush3.bf16.msra.mxu0 %v2787_v54 }
 0x19d   :  { %v2384_v29 = vpop.f32.mrf.mxu0 }
 0x19e   :  { %v2406_v30 = vpop.f32.mrf.mxu1 }
 0x19f   :  { %v2385_v31 = vpop.f32.mrf.mxu0 }
 0x1a0   :  { %v2407_v32 = vpop.f32.mrf.mxu1  ;;  %v2386_v34 = vadd.f32 %v2385_v31, %v2384_v29 }
 0x1a1   :  { %v2387_v35 = vpop.f32.mrf.mxu0  ;;  %v2408_v41 = vadd.f32 %v2407_v32, %v2406_v30 }
 0x1a2   :  { %v2409_v36 = vpop.f32.mrf.mxu1  ;;  %v1647_v39 = vadd.f32 %v2386_v34, %v1607_v33 }
 0x1a3   :  { %v2388_v49 = vpop.f32.mrf.mxu0 }
 0x1a4   :  { %v2410_v52 = vpop.f32.mrf.mxu1  ;;  %v1687_v42 = vadd.f32 %v2408_v41, %v1647_v39 }
 0x1a6   :  { %v1694_v43 = vmax.f32 %v1687_v42, 0.0 }
 0x1a8   :  { %v1746_v44 = vpack.c.bf16 %v1694_v43, %v1694_v43 }
 0x1aa   :  { %2469 = vmatmul.mubr.bf16.vlgmr.msra.gmra.mxu1 %v1746_v44 }
 0x229   :  { %v2428_v55 = vpop.f32.mrf.mxu0 }
 0x22b   :  { %v2429_v56 = vpop.f32.mrf.mxu0 }
 0x22c   :  { %v2430_v59 = vadd.f32 %v2429_v56, %v2428_v55 }
 0x22d   :  { %v2431_v57 = vpop.f32.mrf.mxu0 }
 0x22e   :  { %v1932_v61 = vadd.f32 %v2430_v59, %v2290_v60 }
 0x22f   :  { %v2432_v58 = vpop.f32.mrf.mxu0 }
 0x26a   :  { %v1971_v62 = vpop.f32.mrf.mxu1 }
 0x26b   :  { %v1972_v63 = vadd.f32 %v1971_v62, %v1932_v61 }
 0x26c   :  { %v2470_v0 = vpop.f32.mrf.mxu1 }
 0x26d   :  { %v1977_v1 = vmax.f32 %v1972_v63, 0.0 }
 0x26e   :  { %v1974_v2 = vpop.f32.mrf.mxu1 }
 0x26f   :  { %v1995_v3 = vpack.c.bf16 %v1977_v1, %v1977_v1 }
 0x270   :  { %v2471_v8 = vpop.f32.mrf.mxu1 }
 0x271   :  { %2489 = vmatmul.mubr.bf16.vlgmr.msra.gmra.mxu0 %v1995_v3 }
 0x331   :  { %v2084_v9 = vpop.f32.mrf.mxu0 }
 0x332   :  { %v2085_v4 = vadd.f32 %v2315_v38, %v2084_v9 }
 0x333   :  { %v2490_v5 = vpop.f32.mrf.mxu0 }
 0x334   :  { %v2090_v6 = vmax.f32 %v2085_v4, 0.0 }
 0x335   :  { %v2087_v7 = vpop.f32.mrf.mxu0 }
 0x336   :  { %2091 = vst [vmem:[%s3053_s7] sm:$0xff] %v2090_v6 }
 0x337   :  { %v2491_v37 = vpop.f32.mrf.mxu0 }
 0x338   :  { %2096 = vsyncpa [#allocation3], 1 }
 0x339   :  { %2097 = vsyncpa [#allocation5], 1 }

</bundles_post_ra>
